<compile_context>
chip_gen: v5e
topology: v5e:2x2
jax: 0.10.0
libtpu: 0.0.40
codegen_flags: <defaults>
</compile_context>

<pallas_src>
import jax
import jax.numpy as jnp
from jax.experimental import pallas as pl
from jax.experimental.pallas import tpu as pltpu

LANE = 128    # TPU lane width: pad hidden dims so stores/matmuls are lane-dense
SUB = 8       # sublane granularity for row counts
BN_EPS = 1e-5


def _rup(x, m):
    return ((x + m - 1) // m) * m


def _pad2d(x, rows, cols):
    return jnp.pad(x, ((0, rows - x.shape[0]), (0, cols - x.shape[1])))


def _fold_bn(w, b, gamma, beta, mean, var):
    """Fold an eval-mode BatchNorm1d that follows `x @ w + b` into (w, b). f32."""
    scale = gamma * jax.lax.rsqrt(var + BN_EPS)
    return w * scale[None, :], b * scale + (beta - mean * scale)


def _vmem_limit_bytes():
    """Generation-aware VMEM cap: physical capacity minus headroom."""
    try:
        cap = int(pltpu.get_tpu_info().vmem_capacity_bytes)
        return int(max(32 * 1024 * 1024,
                       min(cap - 16 * 1024 * 1024, 112 * 1024 * 1024)))
    except Exception:
        return 48 * 1024 * 1024       # safe on every generation (v7x has 64 MiB)


# ---------------------------------------------------------------------------
# Fused encoder kernel: all GIN-virtual layers + sum readout in ONE pallas_call
# ---------------------------------------------------------------------------
def _encoder_kernel(eps_ref,                                   # SMEM (L,)
                    h0_ref, vn0_ref,                           # constants (f32)
                    src_ref, dst_ref, bcol_ref, brow_ref,      # int32 index vecs
                    ee_ref, w1_ref, w2_ref, vw1_ref, vw2_ref,  # per-layer (bf16)
                    bias_ref,                                  # per-layer (8,H2p) f32
                    hout_ref, gout_ref,                        # outputs (f32)
                    h_scr, vn_scr):                            # carried VMEM scratch
    l = pl.program_id(0)
    nl = pl.num_programs(0)
    Np, Hp = h_scr.shape
    Gp = vn_scr.shape[0]
    Ep = src_ref.shape[0]

    @pl.when(l == 0)
    def _():
        h_scr[...] = h0_ref[...]
        vn_scr[...] = vn0_ref[...]

    h = h_scr[...]
    vn = vn_scr[...]

    # h_in = h + vn[batch]  -- one-hot built in-kernel from int32 batch ids;
    # K = Gp is tiny so this matmul stays exact f32.
    boh = (jax.lax.broadcasted_iota(jnp.int32, (Np, Gp), 1)
           == bcol_ref[...]).astype(jnp.float32)                     # (N, G)
    h_in = h + jnp.dot(boh, vn, preferred_element_type=jnp.float32)
    h_in_b = h_in.astype(jnp.bfloat16)

    # GIN message passing: gather / scatter-add selection matrices are built on
    # the fly from the edge index vectors (no O(E*N) operands in HBM/VMEM) and
    # fed to the MXU in bf16 with f32 accumulation.
    g_oh = (jax.lax.broadcasted_iota(jnp.int32, (Ep, Np), 1)
            == src_ref[...]).astype(jnp.bfloat16)                    # row e -> src[e]
    gathered = jnp.dot(g_oh, h_in_b, preferred_element_type=jnp.float32)   # (E, Hp)
    msgs = jnp.maximum(gathered + ee_ref[...].astype(jnp.float32), 0.0)     # relu
    s_oh = (jax.lax.broadcasted_iota(jnp.int32, (Np, Ep), 0)
            == dst_ref[...]).astype(jnp.bfloat16)                    # col e -> dst[e]
    agg = jnp.dot(s_oh, msgs.astype(jnp.bfloat16),
                  preferred_element_type=jnp.float32)                # (N, Hp)

    z = (1.0 + eps_ref[l]) * h_in + agg

    # GIN MLP: Linear -> BN -> ReLU -> Linear -> BN (BNs folded into bf16 w's).
    b1 = bias_ref[0:1, :]
    b2 = bias_ref[1:2, :Hp]
    t = jnp.maximum(
        jnp.dot(z.astype(jnp.bfloat16), w1_ref[...],
                preferred_element_type=jnp.float32) + b1, 0.0)
    o = jnp.dot(t.astype(jnp.bfloat16), w2_ref[...],
                preferred_element_type=jnp.float32) + b2

    # Graph pooling matrix (G, N) from batch ids (VN update + final readout).
    pool = (jax.lax.broadcasted_iota(jnp.int32, (Gp, Np), 0)
            == brow_ref[...]).astype(jnp.float32)

    @pl.when(l < nl - 1)
    def _():
        # ReLU (non-final layer), dropout = identity, residual adds h_in.
        h_scr[...] = jnp.maximum(o, 0.0) + h_in
        # virtual-node update: vn = MLP(global_add_pool(h_in) + vn)
        pooled = jnp.dot(pool, h_in, preferred_element_type=jnp.float32)
        vb1 = bias_ref[2:3, :]
        vb2 = bias_ref[3:4, :Hp]
        vt = jnp.maximum(
            jnp.dot((pooled + vn).astype(jnp.bfloat16), vw1_ref[...],
                    preferred_element_type=jnp.float32) + vb1, 0.0)
        vn_scr[...] = jnp.maximum(
            jnp.dot(vt.astype(jnp.bfloat16), vw2_ref[...],
                    preferred_element_type=jnp.float32) + vb2, 0.0)

    @pl.when(l == nl - 1)
    def _():
        h_last = o + h_in                               # final layer: no ReLU
        hout_ref[...] = h_last
        gout_ref[...] = jnp.dot(pool, h_last,           # readout = 'sum'
                                preferred_element_type=jnp.float32)


def gnn_encoder_pallas(eps_all, h0, vn0, src_col, dst_row, batch_col, batch_row,
                       ee, w1, w2, vw1, vw2, biases, *, single_buffer_consts=True):
    L, Ep, Hp = ee.shape
    Np = h0.shape[0]
    Gp = vn0.shape[0]
    H2p = w1.shape[-1]

    def const(shape):
        kw = {"pipeline_mode": pl.Buffered(1)} if single_buffer_consts else {}
        return pl.BlockSpec(shape, lambda l, _n=len(shape): (0,) * _n, **kw)

    def per_layer(shape):   # leading layer dim squeezed out of the kernel view
        return pl.BlockSpec((None,) + shape,
                            lambda l, _n=len(shape): (l,) + (0,) * _n)

    def per_vn_layer(shape):  # clamp: last step reuses layer L-2's block (no DMA)
        return pl.BlockSpec((None,) + shape,
                            lambda l, _n=len(shape):
                            (jnp.minimum(l, L - 2),) + (0,) * _n)

    return pl.pallas_call(
        _encoder_kernel,
        grid=(L,),
        in_specs=[
            pl.BlockSpec(memory_space=pltpu.MemorySpace.SMEM),  # eps (L,)
            const((Np, Hp)),           # h0
            const((Gp, Hp)),           # vn0
            const((Ep, 1)),            # src node ids (column)
            const((1, Ep)),            # dst node ids (row)
            const((Np, 1)),            # batch ids (column)
            const((1, Np)),            # batch ids (row)
            per_layer((Ep, Hp)),       # per-layer edge embeddings (bf16)
            per_layer((Hp, H2p)),      # w1 (BN1 folded, bf16)
            per_layer((H2p, Hp)),      # w2 (layer BN folded, bf16)
            per_vn_layer((Hp, H2p)),   # vn mlp w1 (bf16, L-1 entries)
            per_vn_layer((H2p, Hp)),   # vn mlp w2 (bf16, L-1 entries)
            per_layer((8, H2p)),       # b1/b2/vb1/vb2 packed, one DMA per layer
        ],
        out_specs=(pl.BlockSpec((Np, Hp), lambda l: (0, 0)),
                   pl.BlockSpec((Gp, Hp), lambda l: (0, 0))),
        out_shape=(jax.ShapeDtypeStruct((Np, Hp), jnp.float32),
                   jax.ShapeDtypeStruct((Gp, Hp), jnp.float32)),
        scratch_shapes=[pltpu.VMEM((Np, Hp), jnp.float32),
                        pltpu.VMEM((Gp, Hp), jnp.float32)],
        compiler_params=pltpu.CompilerParams(
            dimension_semantics=("arbitrary",),     # layer axis is sequential
            vmem_limit_bytes=_vmem_limit_bytes()),
    )(eps_all, h0, vn0, src_col, dst_row, batch_col, batch_row,
      ee, w1, w2, vw1, vw2, biases)


# ---------------------------------------------------------------------------
# Parameter init (deterministic, synthetic) + forward
# ---------------------------------------------------------------------------
def init_params(key, num_layer, hidden):
    H, H2 = hidden, 2 * hidden
    ks = iter(jax.random.split(key, 64))
    nrm = lambda shape: 0.1 * jax.random.normal(next(ks), shape, jnp.float32)

    params = {
        "atom_emb1": nrm((119, H)),   # num_atom_type = 119
        "atom_emb2": nrm((3, H)),     # chirality tags
        "vn_emb": jnp.zeros((1, H), jnp.float32),   # virtual node emb (init 0)
        "layers": [],
        "vn_mlps": [],
    }
    for _ in range(num_layer):
        params["layers"].append(dict(
            edge_emb1=nrm((5, H)),    # num_edge_type = 5
            edge_emb2=nrm((3, H)),    # bond direction
            w1=nrm((H, H2)), b1=jnp.zeros((H2,), jnp.float32),
            bn1_g=jnp.ones((H2,), jnp.float32), bn1_b=jnp.zeros((H2,), jnp.float32),
            bn1_m=jnp.zeros((H2,), jnp.float32), bn1_v=jnp.ones((H2,), jnp.float32),
            w2=nrm((H2, H)), b2=jnp.zeros((H,), jnp.float32),
            bn_g=jnp.ones((H,), jnp.float32), bn_b=jnp.zeros((H,), jnp.float32),
            bn_m=jnp.zeros((H,), jnp.float32), bn_v=jnp.ones((H,), jnp.float32),
            eps=jnp.zeros((), jnp.float32),
        ))
    for _ in range(num_layer - 1):
        params["vn_mlps"].append(dict(
            w1=nrm((H, H2)), b1=jnp.zeros((H2,), jnp.float32),
            g1=jnp.ones((H2,), jnp.float32), be1=jnp.zeros((H2,), jnp.float32),
            m1=jnp.zeros((H2,), jnp.float32), v1=jnp.ones((H2,), jnp.float32),
            w2=nrm((H2, H)), b2=jnp.zeros((H,), jnp.float32),
            g2=jnp.ones((H,), jnp.float32), be2=jnp.zeros((H,), jnp.float32),
            m2=jnp.zeros((H,), jnp.float32), v2=jnp.ones((H,), jnp.float32),
        ))
    return params


def gnn_forward(params, data):
    atom_type, chirality = data["atom_type"], data["chirality"]
    edge_type, edge_dir = data["edge_type"], data["edge_dir"]
    src, dst, batch = data["src"], data["dst"], data["batch"]

    layers = params["layers"]
    L = len(layers)
    assert L >= 2, "GIN-virtual encoder requires num_layer >= 2"
    H = params["atom_emb1"].shape[1]
    H2 = layers[0]["w1"].shape[1]
    Hp = _rup(max(H, LANE), LANE)
    H2p = _rup(max(H2, LANE), LANE)

    N = atom_type.shape[0]
    E = edge_type.shape[0]
    G = int(data["num_graphs"])
    Np, Ep, Gp = _rup(N, SUB), _rup(E, SUB), _rup(G, SUB)

    # --- trace-time glue: embedding lookups, BN folding (f32), padding ---
    h0 = params["atom_emb1"][atom_type] + params["atom_emb2"][chirality]  # (N,H)
    h0 = _pad2d(h0, Np, Hp)
    vn0 = jnp.zeros((Gp, Hp), jnp.float32).at[:G, :H].set(
        jnp.broadcast_to(params["vn_emb"], (G, H)))

    # Index vectors (padding value -1 never matches any iota => padded rows/cols
    # of the in-kernel one-hot matrices are all-zero and contribute nothing).
    pad_idx = lambda v, n: jnp.pad(v.astype(jnp.int32), (0, n - v.shape[0]),
                                   constant_values=-1)
    src_col = pad_idx(src, Ep)[:, None]          # (Ep, 1)
    dst_row = pad_idx(dst, Ep)[None, :]          # (1, Ep)
    batch_p = pad_idx(batch, Np)
    batch_col = batch_p[:, None]                 # (Np, 1)
    batch_row = batch_p[None, :]                 # (1, Np)

    # Virtual-node MLPs (exactly L-1 of them; BN folded in f32, cast to bf16).
    vw1s, vw2s, vb1s, vb2s = [], [], [], []
    for vp in params["vn_mlps"]:
        a1, c1 = _fold_bn(vp["w1"], vp["b1"], vp["g1"], vp["be1"], vp["m1"], vp["v1"])
        a2, c2 = _fold_bn(vp["w2"], vp["b2"], vp["g2"], vp["be2"], vp["m2"], vp["v2"])
        vw1s.append(_pad2d(a1, Hp, H2p).astype(jnp.bfloat16))
        vw2s.append(_pad2d(a2, H2p, Hp).astype(jnp.bfloat16))
        vb1s.append(c1)
        vb2s.append(c2)

    ee, w1s, w2s, biases, epss = [], [], [], [], []
    for li, lp in enumerate(layers):
        e = lp["edge_emb1"][edge_type] + lp["edge_emb2"][edge_dir]      # (E,H)
        ee.append(_pad2d(e, Ep, Hp).astype(jnp.bfloat16))
        w1f, b1f = _fold_bn(lp["w1"], lp["b1"], lp["bn1_g"], lp["bn1_b"],
                            lp["bn1_m"], lp["bn1_v"])
        w2f, b2f = _fold_bn(lp["w2"], lp["b2"], lp["bn_g"], lp["bn_b"],
                            lp["bn_m"], lp["bn_v"])
        w1s.append(_pad2d(w1f, Hp, H2p).astype(jnp.bfloat16))
        w2s.append(_pad2d(w2f, H2p, Hp).astype(jnp.bfloat16))
        b = jnp.zeros((8, H2p), jnp.float32).at[0, :H2].set(b1f).at[1, :H].set(b2f)
        if li < L - 1:
            b = b.at[2, :H2].set(vb1s[li]).at[3, :H].set(vb2s[li])
        biases.append(b)
        epss.append(lp["eps"])

    args = (jnp.stack(epss), h0, vn0, src_col, dst_row, batch_col, batch_row,
            jnp.stack(ee), jnp.stack(w1s), jnp.stack(w2s),
            jnp.stack(vw1s), jnp.stack(vw2s), jnp.stack(biases))

    try:
        h_node_p, graph_p = gnn_encoder_pallas(*args, single_buffer_consts=True)
    except Exception:
        # pipeline_mode=pl.Buffered(1) unsupported on this build; constants are
        # tiny (index vectors + h0/vn0), so default double buffering is fine.
        h_node_p, graph_p = gnn_encoder_pallas(*args, single_buffer_consts=False)

    return {"graph": graph_p[:G, :H], "node": h_node_p[:N, :H]}


if __name__ == "__main__":
    key = jax.random.PRNGKey(0)
    N, H, G, num_layer = 16, 32, 2, 3        # 16 nodes, hidden 32, 2 graphs, 3 layers
    npg = N // G

    k1, k2, k3, k4, kp = jax.random.split(key, 5)
    atom_type = jax.random.randint(k1, (N,), 0, 119, jnp.int32)
    chirality = jax.random.randint(k2, (N,), 0, 3, jnp.int32)

    # ring topology inside each graph (both directions)
    src_l, dst_l = [], []
    for g in range(G):
        base = g * npg
        for i in range(npg):
            a, b = base + i, base + (i + 1) % npg
            src_l += [a, b]
            dst_l += [b, a]
    src = jnp.array(src_l, jnp.int32)
    dst = jnp.array(dst_l, jnp.int32)
    E = src.shape[0]
    edge_type = jax.random.randint(k3, (E,), 0, 5, jnp.int32)
    edge_dir = jax.random.randint(k4, (E,), 0, 3, jnp.int32)
    batch = jnp.repeat(jnp.arange(G, dtype=jnp.int32), npg)

    data = dict(
        atom_type=atom_type, chirality=chirality,
        edge_type=edge_type, edge_dir=edge_dir,
        src=src, dst=dst, batch=batch, num_graphs=G,
    )

    params = init_params(kp, num_layer, H)
    out = jax.block_until_ready(gnn_forward(params, data))

    assert out["node"].shape == (N, H)
    assert out["graph"].shape == (G, H)
    assert bool(jnp.all(jnp.isfinite(out["node"]))) and bool(jnp.all(jnp.isfinite(out["graph"])))
    print("KERNEL_OK")
</pallas_src>

<mosaic_0001>
module attributes {stable_mosaic.version = 11 : i64} {
  func.func @_encoder_kernel(%arg0: i32, %arg1: memref<3xf32, #tpu.memory_space<smem>>, %arg2: memref<16x128xf32, #tpu.memory_space<vmem>>, %arg3: memref<8x128xf32, #tpu.memory_space<vmem>>, %arg4: memref<32x1xi32, #tpu.memory_space<vmem>>, %arg5: memref<1x32xi32, #tpu.memory_space<vmem>>, %arg6: memref<16x1xi32, #tpu.memory_space<vmem>>, %arg7: memref<1x16xi32, #tpu.memory_space<vmem>>, %arg8: memref<1x32x128xbf16, #tpu.memory_space<vmem>>, %arg9: memref<1x128x128xbf16, #tpu.memory_space<vmem>>, %arg10: memref<1x128x128xbf16, #tpu.memory_space<vmem>>, %arg11: memref<1x128x128xbf16, #tpu.memory_space<vmem>>, %arg12: memref<1x128x128xbf16, #tpu.memory_space<vmem>>, %arg13: memref<1x8x128xf32, #tpu.memory_space<vmem>>, %arg14: memref<16x128xf32, #tpu.memory_space<vmem>>, %arg15: memref<8x128xf32, #tpu.memory_space<vmem>>, %arg16: memref<16x128xf32, #tpu.memory_space<vmem>>, %arg17: memref<8x128xf32, #tpu.memory_space<vmem>>) attributes {dimension_semantics = [#tpu.dimension_semantics<arbitrary>], iteration_bounds = array<i64: 3>, scalar_prefetch = 0 : i64, scratch_operands = 2 : i64, tpu.core_type = #tpu.core_type<tc>, window_params = [{transform_indices = @transform_0, window_bounds = array<i64: 3>}, {pipeline_mode = #tpu.pipeline_mode<synchronous>, transform_indices = @transform_1, window_bounds = array<i64: 16, 128>}, {pipeline_mode = #tpu.pipeline_mode<synchronous>, transform_indices = @transform_2, window_bounds = array<i64: 8, 128>}, {pipeline_mode = #tpu.pipeline_mode<synchronous>, transform_indices = @transform_3, window_bounds = array<i64: 32, 1>}, {pipeline_mode = #tpu.pipeline_mode<synchronous>, transform_indices = @transform_4, window_bounds = array<i64: 1, 32>}, {pipeline_mode = #tpu.pipeline_mode<synchronous>, transform_indices = @transform_5, window_bounds = array<i64: 16, 1>}, {pipeline_mode = #tpu.pipeline_mode<synchronous>, transform_indices = @transform_6, window_bounds = array<i64: 1, 16>}, {transform_indices = @transform_7, window_bounds = array<i64: 1, 32, 128>}, {transform_indices = @transform_8, window_bounds = array<i64: 1, 128, 128>}, {transform_indices = @transform_9, window_bounds = array<i64: 1, 128, 128>}, {transform_indices = @transform_10, window_bounds = array<i64: 1, 128, 128>}, {transform_indices = @transform_11, window_bounds = array<i64: 1, 128, 128>}, {transform_indices = @transform_12, window_bounds = array<i64: 1, 8, 128>}, {pipeline_mode = #tpu.pipeline_mode<synchronous>, transform_indices = @transform_13, window_bounds = array<i64: 16, 128>}, {pipeline_mode = #tpu.pipeline_mode<synchronous>, transform_indices = @transform_14, window_bounds = array<i64: 8, 128>}]} {
    %c0_i32 = arith.constant 0 : i32
    %0 = arith.cmpi eq, %arg0, %c0_i32 : i32
    %1 = arith.extui %0 : i1 to i32
    %c0_i32_0 = arith.constant 0 : i32
    %2 = arith.cmpi ne, %1, %c0_i32_0 : i32
    scf.if %2 {
      %c0_36 = arith.constant 0 : index
      %c0_37 = arith.constant 0 : index
      %73 = vector.load %arg2[%c0_36, %c0_37] : memref<16x128xf32, #tpu.memory_space<vmem>>, vector<16x128xf32>
      %c0_38 = arith.constant 0 : index
      %c0_39 = arith.constant 0 : index
      %74 = vector.load %arg16[%c0_38, %c0_39] : memref<16x128xf32, #tpu.memory_space<vmem>>, vector<16x128xf32>
      tpu.vector_store %arg16[%c0_38, %c0_39], %73 {strides = array<i32>} : memref<16x128xf32, #tpu.memory_space<vmem>>, vector<16x128xf32>,
      %c0_40 = arith.constant 0 : index
      %c0_41 = arith.constant 0 : index
      %75 = vector.load %arg3[%c0_40, %c0_41] : memref<8x128xf32, #tpu.memory_space<vmem>>, vector<8x128xf32>
      %c0_42 = arith.constant 0 : index
      %c0_43 = arith.constant 0 : index
      %76 = vector.load %arg17[%c0_42, %c0_43] : memref<8x128xf32, #tpu.memory_space<vmem>>, vector<8x128xf32>
      tpu.vector_store %arg17[%c0_42, %c0_43], %75 {strides = array<i32>} : memref<8x128xf32, #tpu.memory_space<vmem>>, vector<8x128xf32>,
    } else {
    }
    %c0 = arith.constant 0 : index
    %c0_1 = arith.constant 0 : index
    %3 = vector.load %arg16[%c0, %c0_1] : memref<16x128xf32, #tpu.memory_space<vmem>>, vector<16x128xf32>
    %c0_2 = arith.constant 0 : index
    %c0_3 = arith.constant 0 : index
    %4 = vector.load %arg17[%c0_2, %c0_3] : memref<8x128xf32, #tpu.memory_space<vmem>>, vector<8x128xf32>
    %5 = tpu.iota {dimensions = array<i32: 1>} : vector<16x8xi32>
    %c0_4 = arith.constant 0 : index
    %c0_5 = arith.constant 0 : index
    %6 = vector.load %arg6[%c0_4, %c0_5] : memref<16x1xi32, #tpu.memory_space<vmem>>, vector<16x1xi32>
    %7 = vector.broadcast %6 : vector<16x1xi32> to vector<16x8xi32>
    %8 = arith.cmpi eq, %5, %7 : vector<16x8xi32>
    %9 = arith.extui %8 : vector<16x8xi1> to vector<16x8xi32>
    %10 = arith.sitofp %9 : vector<16x8xi32> to vector<16x8xf32>
    %cst = arith.constant dense<0.000000e+00> : vector<16x128xf32>
    %11 = tpu.matmul %10, %4, %cst {dimension_numbers = #tpu.dot_dimension_numbers<[1], [0], [0], [1], [0, 0, 1, 1], [], []>} : vector<16x8xf32>, vector<8x128xf32>, vector<16x128xf32> -> vector<16x128xf32>
    %12 = arith.addf %3, %11 : vector<16x128xf32>
    %13 = arith.truncf %12 : vector<16x128xf32> to vector<16x128xbf16>
    %14 = tpu.iota {dimensions = array<i32: 1>} : vector<32x16xi32>
    %c0_6 = arith.constant 0 : index
    %c0_7 = arith.constant 0 : index
    %15 = vector.load %arg4[%c0_6, %c0_7] : memref<32x1xi32, #tpu.memory_space<vmem>>, vector<32x1xi32>
    %16 = vector.broadcast %15 : vector<32x1xi32> to vector<32x16xi32>
    %17 = arith.cmpi eq, %14, %16 : vector<32x16xi32>
    %18 = arith.extui %17 : vector<32x16xi1> to vector<32x16xi32>
    %19 = arith.sitofp %18 : vector<32x16xi32> to vector<32x16xf32>
    %20 = arith.truncf %19 : vector<32x16xf32> to vector<32x16xbf16>
    %cst_8 = arith.constant dense<0.000000e+00> : vector<32x128xf32>
    %21 = tpu.matmul %20, %13, %cst_8 {dimension_numbers = #tpu.dot_dimension_numbers<[1], [0], [0], [1], [0, 0, 1, 1], [], []>} : vector<32x16xbf16>, vector<16x128xbf16>, vector<32x128xf32> -> vector<32x128xf32>
    %c0_9 = arith.constant 0 : index
    %c0_10 = arith.constant 0 : index
    %c0_11 = arith.constant 0 : index
    %22 = vector.load %arg8[%c0_9, %c0_10, %c0_11] : memref<1x32x128xbf16, #tpu.memory_space<vmem>>, vector<1x32x128xbf16>
    %23 = vector.shape_cast %22 : vector<1x32x128xbf16> to vector<32x128xbf16>
    %24 = arith.extf %23 : vector<32x128xbf16> to vector<32x128xf32>
    %25 = arith.addf %21, %24 : vector<32x128xf32>
    %cst_12 = arith.constant 0.000000e+00 : f32
    %26 = vector.broadcast %cst_12 : f32 to vector<32x128xf32>
    %27 = arith.maximumf %25, %26 : vector<32x128xf32>
    %28 = tpu.iota {dimensions = array<i32: 0>} : vector<16x32xi32>
    %c0_13 = arith.constant 0 : index
    %c0_14 = arith.constant 0 : index
    %29 = vector.load %arg5[%c0_13, %c0_14] : memref<1x32xi32, #tpu.memory_space<vmem>>, vector<1x32xi32>
    %30 = vector.broadcast %29 : vector<1x32xi32> to vector<16x32xi32>
    %31 = arith.cmpi eq, %28, %30 : vector<16x32xi32>
    %32 = arith.extui %31 : vector<16x32xi1> to vector<16x32xi32>
    %33 = arith.sitofp %32 : vector<16x32xi32> to vector<16x32xf32>
    %34 = arith.truncf %33 : vector<16x32xf32> to vector<16x32xbf16>
    %35 = arith.truncf %27 : vector<32x128xf32> to vector<32x128xbf16>
    %cst_15 = arith.constant dense<0.000000e+00> : vector<16x128xf32>
    %36 = tpu.matmul %34, %35, %cst_15 {dimension_numbers = #tpu.dot_dimension_numbers<[1], [0], [0], [1], [0, 0, 1, 1], [], []>} : vector<16x32xbf16>, vector<32x128xbf16>, vector<16x128xf32> -> vector<16x128xf32>
    %37 = arith.index_cast %arg0 : i32 to index
    %38 = memref.load %arg1[%37] : memref<3xf32, #tpu.memory_space<smem>>
    %cst_16 = arith.constant 1.000000e+00 : f32
    %39 = arith.addf %cst_16, %38 : f32
    %40 = vector.broadcast %39 : f32 to vector<16x128xf32>
    %41 = arith.mulf %40, %12 : vector<16x128xf32>
    %42 = arith.addf %41, %36 : vector<16x128xf32>
    %c0_17 = arith.constant 0 : index
    %c0_18 = arith.constant 0 : index
    %c0_19 = arith.constant 0 : index
    %43 = vector.load %arg13[%c0_17, %c0_18, %c0_19] : memref<1x8x128xf32, #tpu.memory_space<vmem>>, vector<1x1x128xf32>
    %44 = vector.shape_cast %43 : vector<1x1x128xf32> to vector<1x128xf32>
    %c0_20 = arith.constant 0 : index
    %c1 = arith.constant 1 : index
    %c0_21 = arith.constant 0 : index
    %45 = vector.load %arg13[%c0_20, %c1, %c0_21] : memref<1x8x128xf32, #tpu.memory_space<vmem>>, vector<1x1x128xf32>
    %46 = vector.shape_cast %45 : vector<1x1x128xf32> to vector<1x128xf32>
    %47 = arith.truncf %42 : vector<16x128xf32> to vector<16x128xbf16>
    %c0_22 = arith.constant 0 : index
    %c0_23 = arith.constant 0 : index
    %c0_24 = arith.constant 0 : index
    %48 = vector.load %arg9[%c0_22, %c0_23, %c0_24] : memref<1x128x128xbf16, #tpu.memory_space<vmem>>, vector<1x128x128xbf16>
    %49 = vector.shape_cast %48 : vector<1x128x128xbf16> to vector<128x128xbf16>
    %cst_25 = arith.constant dense<0.000000e+00> : vector<16x128xf32>
    %50 = tpu.matmul %47, %49, %cst_25 {dimension_numbers = #tpu.dot_dimension_numbers<[1], [0], [0], [1], [0, 0, 1, 1], [], []>} : vector<16x128xbf16>, vector<128x128xbf16>, vector<16x128xf32> -> vector<16x128xf32>
    %51 = vector.broadcast %44 : vector<1x128xf32> to vector<16x128xf32>
    %52 = arith.addf %50, %51 : vector<16x128xf32>
    %cst_26 = arith.constant 0.000000e+00 : f32
    %53 = vector.broadcast %cst_26 : f32 to vector<16x128xf32>
    %54 = arith.maximumf %52, %53 : vector<16x128xf32>
    %55 = arith.truncf %54 : vector<16x128xf32> to vector<16x128xbf16>
    %c0_27 = arith.constant 0 : index
    %c0_28 = arith.constant 0 : index
    %c0_29 = arith.constant 0 : index
    %56 = vector.load %arg10[%c0_27, %c0_28, %c0_29] : memref<1x128x128xbf16, #tpu.memory_space<vmem>>, vector<1x128x128xbf16>
    %57 = vector.shape_cast %56 : vector<1x128x128xbf16> to vector<128x128xbf16>
    %cst_30 = arith.constant dense<0.000000e+00> : vector<16x128xf32>
    %58 = tpu.matmul %55, %57, %cst_30 {dimension_numbers = #tpu.dot_dimension_numbers<[1], [0], [0], [1], [0, 0, 1, 1], [], []>} : vector<16x128xbf16>, vector<128x128xbf16>, vector<16x128xf32> -> vector<16x128xf32>
    %59 = vector.broadcast %46 : vector<1x128xf32> to vector<16x128xf32>
    %60 = arith.addf %58, %59 : vector<16x128xf32>
    %61 = tpu.iota {dimensions = array<i32: 0>} : vector<8x16xi32>
    %c0_31 = arith.constant 0 : index
    %c0_32 = arith.constant 0 : index
    %62 = vector.load %arg7[%c0_31, %c0_32] : memref<1x16xi32, #tpu.memory_space<vmem>>, vector<1x16xi32>
    %63 = vector.broadcast %62 : vector<1x16xi32> to vector<8x16xi32>
    %64 = arith.cmpi eq, %61, %63 : vector<8x16xi32>
    %65 = arith.extui %64 : vector<8x16xi1> to vector<8x16xi32>
    %66 = arith.sitofp %65 : vector<8x16xi32> to vector<8x16xf32>
    %c2_i32 = arith.constant 2 : i32
    %67 = arith.cmpi slt, %arg0, %c2_i32 : i32
    %68 = arith.extui %67 : i1 to i32
    %c0_i32_33 = arith.constant 0 : i32
    %69 = arith.cmpi ne, %68, %c0_i32_33 : i32
    scf.if %69 {
      %cst_36 = arith.constant 0.000000e+00 : f32
      %73 = vector.broadcast %cst_36 : f32 to vector<16x128xf32>
      %74 = arith.maximumf %60, %73 : vector<16x128xf32>
      %75 = arith.addf %74, %12 : vector<16x128xf32>
      %c0_37 = arith.constant 0 : index
      %c0_38 = arith.constant 0 : index
      %76 = vector.load %arg16[%c0_37, %c0_38] : memref<16x128xf32, #tpu.memory_space<vmem>>, vector<16x128xf32>
      tpu.vector_store %arg16[%c0_37, %c0_38], %75 {strides = array<i32>} : memref<16x128xf32, #tpu.memory_space<vmem>>, vector<16x128xf32>,
      %cst_39 = arith.constant dense<0.000000e+00> : vector<8x128xf32>
      %77 = tpu.matmul %66, %12, %cst_39 {dimension_numbers = #tpu.dot_dimension_numbers<[1], [0], [0], [1], [0, 0, 1, 1], [], []>} : vector<8x16xf32>, vector<16x128xf32>, vector<8x128xf32> -> vector<8x128xf32>
      %c0_40 = arith.constant 0 : index
      %c2 = arith.constant 2 : index
      %c0_41 = arith.constant 0 : index
      %78 = vector.load %arg13[%c0_40, %c2, %c0_41] : memref<1x8x128xf32, #tpu.memory_space<vmem>>, vector<1x1x128xf32>
      %79 = vector.shape_cast %78 : vector<1x1x128xf32> to vector<1x128xf32>
      %c0_42 = arith.constant 0 : index
      %c3 = arith.constant 3 : index
      %c0_43 = arith.constant 0 : index
      %80 = vector.load %arg13[%c0_42, %c3, %c0_43] : memref<1x8x128xf32, #tpu.memory_space<vmem>>, vector<1x1x128xf32>
      %81 = vector.shape_cast %80 : vector<1x1x128xf32> to vector<1x128xf32>
      %82 = arith.addf %77, %4 : vector<8x128xf32>
      %83 = arith.truncf %82 : vector<8x128xf32> to vector<8x128xbf16>
      %c0_44 = arith.constant 0 : index
      %c0_45 = arith.constant 0 : index
      %c0_46 = arith.constant 0 : index
      %84 = vector.load %arg11[%c0_44, %c0_45, %c0_46] : memref<1x128x128xbf16, #tpu.memory_space<vmem>>, vector<1x128x128xbf16>
      %85 = vector.shape_cast %84 : vector<1x128x128xbf16> to vector<128x128xbf16>
      %cst_47 = arith.constant dense<0.000000e+00> : vector<8x128xf32>
      %86 = tpu.matmul %83, %85, %cst_47 {dimension_numbers = #tpu.dot_dimension_numbers<[1], [0], [0], [1], [0, 0, 1, 1], [], []>} : vector<8x128xbf16>, vector<128x128xbf16>, vector<8x128xf32> -> vector<8x128xf32>
      %87 = vector.broadcast %79 : vector<1x128xf32> to vector<8x128xf32>
      %88 = arith.addf %86, %87 : vector<8x128xf32>
      %cst_48 = arith.constant 0.000000e+00 : f32
      %89 = vector.broadcast %cst_48 : f32 to vector<8x128xf32>
      %90 = arith.maximumf %88, %89 : vector<8x128xf32>
      %91 = arith.truncf %90 : vector<8x128xf32> to vector<8x128xbf16>
      %c0_49 = arith.constant 0 : index
      %c0_50 = arith.constant 0 : index
      %c0_51 = arith.constant 0 : index
      %92 = vector.load %arg12[%c0_49, %c0_50, %c0_51] : memref<1x128x128xbf16, #tpu.memory_space<vmem>>, vector<1x128x128xbf16>
      %93 = vector.shape_cast %92 : vector<1x128x128xbf16> to vector<128x128xbf16>
      %cst_52 = arith.constant dense<0.000000e+00> : vector<8x128xf32>
      %94 = tpu.matmul %91, %93, %cst_52 {dimension_numbers = #tpu.dot_dimension_numbers<[1], [0], [0], [1], [0, 0, 1, 1], [], []>} : vector<8x128xbf16>, vector<128x128xbf16>, vector<8x128xf32> -> vector<8x128xf32>
      %95 = vector.broadcast %81 : vector<1x128xf32> to vector<8x128xf32>
      %96 = arith.addf %94, %95 : vector<8x128xf32>
      %cst_53 = arith.constant 0.000000e+00 : f32
      %97 = vector.broadcast %cst_53 : f32 to vector<8x128xf32>
      %98 = arith.maximumf %96, %97 : vector<8x128xf32>
      %c0_54 = arith.constant 0 : index
      %c0_55 = arith.constant 0 : index
      %99 = vector.load %arg17[%c0_54, %c0_55] : memref<8x128xf32, #tpu.memory_space<vmem>>, vector<8x128xf32>
      tpu.vector_store %arg17[%c0_54, %c0_55], %98 {strides = array<i32>} : memref<8x128xf32, #tpu.memory_space<vmem>>, vector<8x128xf32>,
    } else {
    }
    %c2_i32_34 = arith.constant 2 : i32
    %70 = arith.cmpi eq, %arg0, %c2_i32_34 : i32
    %71 = arith.extui %70 : i1 to i32
    %c0_i32_35 = arith.constant 0 : i32
    %72 = arith.cmpi ne, %71, %c0_i32_35 : i32
    scf.if %72 {
      %73 = arith.addf %60, %12 : vector<16x128xf32>
      %c0_36 = arith.constant 0 : index
      %c0_37 = arith.constant 0 : index
      %74 = vector.load %arg14[%c0_36, %c0_37] : memref<16x128xf32, #tpu.memory_space<vmem>>, vector<16x128xf32>
      tpu.vector_store %arg14[%c0_36, %c0_37], %73 {strides = array<i32>} : memref<16x128xf32, #tpu.memory_space<vmem>>, vector<16x128xf32>,
      %cst_38 = arith.constant dense<0.000000e+00> : vector<8x128xf32>
      %75 = tpu.matmul %66, %73, %cst_38 {dimension_numbers = #tpu.dot_dimension_numbers<[1], [0], [0], [1], [0, 0, 1, 1], [], []>} : vector<8x16xf32>, vector<16x128xf32>, vector<8x128xf32> -> vector<8x128xf32>
      %c0_39 = arith.constant 0 : index
      %c0_40 = arith.constant 0 : index
      %76 = vector.load %arg15[%c0_39, %c0_40] : memref<8x128xf32, #tpu.memory_space<vmem>>, vector<8x128xf32>
      tpu.vector_store %arg15[%c0_39, %c0_40], %75 {strides = array<i32>} : memref<8x128xf32, #tpu.memory_space<vmem>>, vector<8x128xf32>,
    } else {
    }
    return
  }
  func.func @transform_0(%arg0: i32) -> i32 {
    %c0_i32 = arith.constant 0 : i32
    %c0_i32_0 = arith.constant 0 : i32
    return %c0_i32 : i32
  }
  func.func @transform_1(%arg0: i32) -> (i32, i32) {
    %c0_i32 = arith.constant 0 : i32
    %c0_i32_0 = arith.constant 0 : i32
    %c0_i32_1 = arith.constant 0 : i32
    return %c0_i32, %c0_i32_0 : i32, i32
  }
  func.func @transform_2(%arg0: i32) -> (i32, i32) {
    %c0_i32 = arith.constant 0 : i32
    %c0_i32_0 = arith.constant 0 : i32
    %c0_i32_1 = arith.constant 0 : i32
    return %c0_i32, %c0_i32_0 : i32, i32
  }
  func.func @transform_3(%arg0: i32) -> (i32, i32) {
    %c0_i32 = arith.constant 0 : i32
    %c0_i32_0 = arith.constant 0 : i32
    %c0_i32_1 = arith.constant 0 : i32
    return %c0_i32, %c0_i32_0 : i32, i32
  }
  func.func @transform_4(%arg0: i32) -> (i32, i32) {
    %c0_i32 = arith.constant 0 : i32
    %c0_i32_0 = arith.constant 0 : i32
    %c0_i32_1 = arith.constant 0 : i32
    return %c0_i32, %c0_i32_0 : i32, i32
  }
  func.func @transform_5(%arg0: i32) -> (i32, i32) {
    %c0_i32 = arith.constant 0 : i32
    %c0_i32_0 = arith.constant 0 : i32
    %c0_i32_1 = arith.constant 0 : i32
    return %c0_i32, %c0_i32_0 : i32, i32
  }
  func.func @transform_6(%arg0: i32) -> (i32, i32) {
    %c0_i32 = arith.constant 0 : i32
    %c0_i32_0 = arith.constant 0 : i32
    %c0_i32_1 = arith.constant 0 : i32
    return %c0_i32, %c0_i32_0 : i32, i32
  }
  func.func @transform_7(%arg0: i32) -> (i32, i32, i32) {
    %c0_i32 = arith.constant 0 : i32
    %c0_i32_0 = arith.constant 0 : i32
    %c0_i32_1 = arith.constant 0 : i32
    return %arg0, %c0_i32, %c0_i32_0 : i32, i32, i32
  }
  func.func @transform_8(%arg0: i32) -> (i32, i32, i32) {
    %c0_i32 = arith.constant 0 : i32
    %c0_i32_0 = arith.constant 0 : i32
    %c0_i32_1 = arith.constant 0 : i32
    return %arg0, %c0_i32, %c0_i32_0 : i32, i32, i32
  }
  func.func @transform_9(%arg0: i32) -> (i32, i32, i32) {
    %c0_i32 = arith.constant 0 : i32
    %c0_i32_0 = arith.constant 0 : i32
    %c0_i32_1 = arith.constant 0 : i32
    return %arg0, %c0_i32, %c0_i32_0 : i32, i32, i32
  }
  func.func @transform_10(%arg0: i32) -> (i32, i32, i32) {
    %c1_i32 = arith.constant 1 : i32
    %0 = arith.minsi %arg0, %c1_i32 : i32
    %c0_i32 = arith.constant 0 : i32
    %c0_i32_0 = arith.constant 0 : i32
    %c0_i32_1 = arith.constant 0 : i32
    return %0, %c0_i32, %c0_i32_0 : i32, i32, i32
  }
  func.func @transform_11(%arg0: i32) -> (i32, i32, i32) {
    %c1_i32 = arith.constant 1 : i32
    %0 = arith.minsi %arg0, %c1_i32 : i32
    %c0_i32 = arith.constant 0 : i32
    %c0_i32_0 = arith.constant 0 : i32
    %c0_i32_1 = arith.constant 0 : i32
    return %0, %c0_i32, %c0_i32_0 : i32, i32, i32
  }
  func.func @transform_12(%arg0: i32) -> (i32, i32, i32) {
    %c0_i32 = arith.constant 0 : i32
    %c0_i32_0 = arith.constant 0 : i32
    %c0_i32_1 = arith.constant 0 : i32
    return %arg0, %c0_i32, %c0_i32_0 : i32, i32, i32
  }
  func.func @transform_13(%arg0: i32) -> (i32, i32) {
    %c0_i32 = arith.constant 0 : i32
    %c0_i32_0 = arith.constant 0 : i32
    %c0_i32_1 = arith.constant 0 : i32
    return %c0_i32, %c0_i32_0 : i32, i32
  }
  func.func @transform_14(%arg0: i32) -> (i32, i32) {
    %c0_i32 = arith.constant 0 : i32
    %c0_i32_0 = arith.constant 0 : i32
    %c0_i32_1 = arith.constant 0 : i32
    return %c0_i32, %c0_i32_0 : i32, i32
  }
}

module attributes {stable_mosaic.version = 11 : i64} {
  func.func @_encoder_kernel(%arg0: i32, %arg1: memref<3xf32, #tpu.memory_space<smem>>, %arg2: memref<16x128xf32, #tpu.memory_space<vmem>>, %arg3: memref<8x128xf32, #tpu.memory_space<vmem>>, %arg4: memref<32x1xi32, #tpu.memory_space<vmem>>, %arg5: memref<1x32xi32, #tpu.memory_space<vmem>>, %arg6: memref<16x1xi32, #tpu.memory_space<vmem>>, %arg7: memref<1x16xi32, #tpu.memory_space<vmem>>, %arg8: memref<1x32x128xbf16, #tpu.memory_space<vmem>>, %arg9: memref<1x128x128xbf16, #tpu.memory_space<vmem>>, %arg10: memref<1x128x128xbf16, #tpu.memory_space<vmem>>, %arg11: memref<1x128x128xbf16, #tpu.memory_space<vmem>>, %arg12: memref<1x128x128xbf16, #tpu.memory_space<vmem>>, %arg13: memref<1x8x128xf32, #tpu.memory_space<vmem>>, %arg14: memref<16x128xf32, #tpu.memory_space<vmem>>, %arg15: memref<8x128xf32, #tpu.memory_space<vmem>>, %arg16: memref<16x128xf32, #tpu.memory_space<vmem>>, %arg17: memref<8x128xf32, #tpu.memory_space<vmem>>) attributes {dimension_semantics = [#tpu.dimension_semantics<arbitrary>], iteration_bounds = array<i64: 3>, scalar_prefetch = 0 : i64, scratch_operands = 2 : i64, tpu.core_type = #tpu.core_type<tc>, window_params = [{transform_indices = @transform_0, window_bounds = array<i64: 3>}, {pipeline_mode = #tpu.pipeline_mode<synchronous>, transform_indices = @transform_1, window_bounds = array<i64: 16, 128>}, {pipeline_mode = #tpu.pipeline_mode<synchronous>, transform_indices = @transform_2, window_bounds = array<i64: 8, 128>}, {pipeline_mode = #tpu.pipeline_mode<synchronous>, transform_indices = @transform_3, window_bounds = array<i64: 32, 1>}, {pipeline_mode = #tpu.pipeline_mode<synchronous>, transform_indices = @transform_4, window_bounds = array<i64: 1, 32>}, {pipeline_mode = #tpu.pipeline_mode<synchronous>, transform_indices = @transform_5, window_bounds = array<i64: 16, 1>}, {pipeline_mode = #tpu.pipeline_mode<synchronous>, transform_indices = @transform_6, window_bounds = array<i64: 1, 16>}, {transform_indices = @transform_7, window_bounds = array<i64: 1, 32, 128>}, {transform_indices = @transform_8, window_bounds = array<i64: 1, 128, 128>}, {transform_indices = @transform_9, window_bounds = array<i64: 1, 128, 128>}, {transform_indices = @transform_10, window_bounds = array<i64: 1, 128, 128>}, {transform_indices = @transform_11, window_bounds = array<i64: 1, 128, 128>}, {transform_indices = @transform_12, window_bounds = array<i64: 1, 8, 128>}, {pipeline_mode = #tpu.pipeline_mode<synchronous>, transform_indices = @transform_13, window_bounds = array<i64: 16, 128>}, {pipeline_mode = #tpu.pipeline_mode<synchronous>, transform_indices = @transform_14, window_bounds = array<i64: 8, 128>}]} {
    %c0_i32 = arith.constant 0 : i32
    %0 = arith.cmpi eq, %arg0, %c0_i32 : i32
    %1 = arith.extui %0 : i1 to i32
    %c0_i32_0 = arith.constant 0 : i32
    %2 = arith.cmpi ne, %1, %c0_i32_0 : i32
    scf.if %2 {
      %c0_36 = arith.constant 0 : index
      %c0_37 = arith.constant 0 : index
      %73 = vector.load %arg2[%c0_36, %c0_37] : memref<16x128xf32, #tpu.memory_space<vmem>>, vector<16x128xf32>
      %c0_38 = arith.constant 0 : index
      %c0_39 = arith.constant 0 : index
      %74 = vector.load %arg16[%c0_38, %c0_39] : memref<16x128xf32, #tpu.memory_space<vmem>>, vector<16x128xf32>
      tpu.vector_store %arg16[%c0_38, %c0_39], %73 {strides = array<i32>} : memref<16x128xf32, #tpu.memory_space<vmem>>, vector<16x128xf32>,
      %c0_40 = arith.constant 0 : index
      %c0_41 = arith.constant 0 : index
      %75 = vector.load %arg3[%c0_40, %c0_41] : memref<8x128xf32, #tpu.memory_space<vmem>>, vector<8x128xf32>
      %c0_42 = arith.constant 0 : index
      %c0_43 = arith.constant 0 : index
      %76 = vector.load %arg17[%c0_42, %c0_43] : memref<8x128xf32, #tpu.memory_space<vmem>>, vector<8x128xf32>
      tpu.vector_store %arg17[%c0_42, %c0_43], %75 {strides = array<i32>} : memref<8x128xf32, #tpu.memory_space<vmem>>, vector<8x128xf32>,
    } else {
    }
    %c0 = arith.constant 0 : index
    %c0_1 = arith.constant 0 : index
    %3 = vector.load %arg16[%c0, %c0_1] : memref<16x128xf32, #tpu.memory_space<vmem>>, vector<16x128xf32>
    %c0_2 = arith.constant 0 : index
    %c0_3 = arith.constant 0 : index
    %4 = vector.load %arg17[%c0_2, %c0_3] : memref<8x128xf32, #tpu.memory_space<vmem>>, vector<8x128xf32>
    %5 = tpu.iota {dimensions = array<i32: 1>} : vector<16x8xi32>
    %c0_4 = arith.constant 0 : index
    %c0_5 = arith.constant 0 : index
    %6 = vector.load %arg6[%c0_4, %c0_5] : memref<16x1xi32, #tpu.memory_space<vmem>>, vector<16x1xi32>
    %7 = vector.broadcast %6 : vector<16x1xi32> to vector<16x8xi32>
    %8 = arith.cmpi eq, %5, %7 : vector<16x8xi32>
    %9 = arith.extui %8 : vector<16x8xi1> to vector<16x8xi32>
    %10 = arith.sitofp %9 : vector<16x8xi32> to vector<16x8xf32>
    %cst = arith.constant dense<0.000000e+00> : vector<16x128xf32>
    %11 = tpu.matmul %10, %4, %cst {dimension_numbers = #tpu.dot_dimension_numbers<[1], [0], [0], [1], [0, 0, 1, 1], [], []>} : vector<16x8xf32>, vector<8x128xf32>, vector<16x128xf32> -> vector<16x128xf32>
    %12 = arith.addf %3, %11 : vector<16x128xf32>
    %13 = arith.truncf %12 : vector<16x128xf32> to vector<16x128xbf16>
    %14 = tpu.iota {dimensions = array<i32: 1>} : vector<32x16xi32>
    %c0_6 = arith.constant 0 : index
    %c0_7 = arith.constant 0 : index
    %15 = vector.load %arg4[%c0_6, %c0_7] : memref<32x1xi32, #tpu.memory_space<vmem>>, vector<32x1xi32>
    %16 = vector.broadcast %15 : vector<32x1xi32> to vector<32x16xi32>
    %17 = arith.cmpi eq, %14, %16 : vector<32x16xi32>
    %18 = arith.extui %17 : vector<32x16xi1> to vector<32x16xi32>
    %19 = arith.sitofp %18 : vector<32x16xi32> to vector<32x16xf32>
    %20 = arith.truncf %19 : vector<32x16xf32> to vector<32x16xbf16>
    %cst_8 = arith.constant dense<0.000000e+00> : vector<32x128xf32>
    %21 = tpu.matmul %20, %13, %cst_8 {dimension_numbers = #tpu.dot_dimension_numbers<[1], [0], [0], [1], [0, 0, 1, 1], [], []>} : vector<32x16xbf16>, vector<16x128xbf16>, vector<32x128xf32> -> vector<32x128xf32>
    %c0_9 = arith.constant 0 : index
    %c0_10 = arith.constant 0 : index
    %c0_11 = arith.constant 0 : index
    %22 = vector.load %arg8[%c0_9, %c0_10, %c0_11] : memref<1x32x128xbf16, #tpu.memory_space<vmem>>, vector<1x32x128xbf16>
    %23 = vector.shape_cast %22 : vector<1x32x128xbf16> to vector<32x128xbf16>
    %24 = arith.extf %23 : vector<32x128xbf16> to vector<32x128xf32>
    %25 = arith.addf %21, %24 : vector<32x128xf32>
    %cst_12 = arith.constant 0.000000e+00 : f32
    %26 = vector.broadcast %cst_12 : f32 to vector<32x128xf32>
    %27 = arith.maximumf %25, %26 : vector<32x128xf32>
    %28 = tpu.iota {dimensions = array<i32: 0>} : vector<16x32xi32>
    %c0_13 = arith.constant 0 : index
    %c0_14 = arith.constant 0 : index
    %29 = vector.load %arg5[%c0_13, %c0_14] : memref<1x32xi32, #tpu.memory_space<vmem>>, vector<1x32xi32>
    %30 = vector.broadcast %29 : vector<1x32xi32> to vector<16x32xi32>
    %31 = arith.cmpi eq, %28, %30 : vector<16x32xi32>
    %32 = arith.extui %31 : vector<16x32xi1> to vector<16x32xi32>
    %33 = arith.sitofp %32 : vector<16x32xi32> to vector<16x32xf32>
    %34 = arith.truncf %33 : vector<16x32xf32> to vector<16x32xbf16>
    %35 = arith.truncf %27 : vector<32x128xf32> to vector<32x128xbf16>
    %cst_15 = arith.constant dense<0.000000e+00> : vector<16x128xf32>
    %36 = tpu.matmul %34, %35, %cst_15 {dimension_numbers = #tpu.dot_dimension_numbers<[1], [0], [0], [1], [0, 0, 1, 1], [], []>} : vector<16x32xbf16>, vector<32x128xbf16>, vector<16x128xf32> -> vector<16x128xf32>
    %37 = arith.index_cast %arg0 : i32 to index
    %38 = memref.load %arg1[%37] : memref<3xf32, #tpu.memory_space<smem>>
    %cst_16 = arith.constant 1.000000e+00 : f32
    %39 = arith.addf %cst_16, %38 : f32
    %40 = vector.broadcast %39 : f32 to vector<16x128xf32>
    %41 = arith.mulf %40, %12 : vector<16x128xf32>
    %42 = arith.addf %41, %36 : vector<16x128xf32>
    %c0_17 = arith.constant 0 : index
    %c0_18 = arith.constant 0 : index
    %c0_19 = arith.constant 0 : index
    %43 = vector.load %arg13[%c0_17, %c0_18, %c0_19] : memref<1x8x128xf32, #tpu.memory_space<vmem>>, vector<1x1x128xf32>
    %44 = vector.shape_cast %43 : vector<1x1x128xf32> to vector<1x128xf32>
    %c0_20 = arith.constant 0 : index
    %c1 = arith.constant 1 : index
    %c0_21 = arith.constant 0 : index
    %45 = vector.load %arg13[%c0_20, %c1, %c0_21] : memref<1x8x128xf32, #tpu.memory_space<vmem>>, vector<1x1x128xf32>
    %46 = vector.shape_cast %45 : vector<1x1x128xf32> to vector<1x128xf32>
    %47 = arith.truncf %42 : vector<16x128xf32> to vector<16x128xbf16>
    %c0_22 = arith.constant 0 : index
    %c0_23 = arith.constant 0 : index
    %c0_24 = arith.constant 0 : index
    %48 = vector.load %arg9[%c0_22, %c0_23, %c0_24] : memref<1x128x128xbf16, #tpu.memory_space<vmem>>, vector<1x128x128xbf16>
    %49 = vector.shape_cast %48 : vector<1x128x128xbf16> to vector<128x128xbf16>
    %cst_25 = arith.constant dense<0.000000e+00> : vector<16x128xf32>
    %50 = tpu.matmul %47, %49, %cst_25 {dimension_numbers = #tpu.dot_dimension_numbers<[1], [0], [0], [1], [0, 0, 1, 1], [], []>} : vector<16x128xbf16>, vector<128x128xbf16>, vector<16x128xf32> -> vector<16x128xf32>
    %51 = vector.broadcast %44 : vector<1x128xf32> to vector<16x128xf32>
    %52 = arith.addf %50, %51 : vector<16x128xf32>
    %cst_26 = arith.constant 0.000000e+00 : f32
    %53 = vector.broadcast %cst_26 : f32 to vector<16x128xf32>
    %54 = arith.maximumf %52, %53 : vector<16x128xf32>
    %55 = arith.truncf %54 : vector<16x128xf32> to vector<16x128xbf16>
    %c0_27 = arith.constant 0 : index
    %c0_28 = arith.constant 0 : index
    %c0_29 = arith.constant 0 : index
    %56 = vector.load %arg10[%c0_27, %c0_28, %c0_29] : memref<1x128x128xbf16, #tpu.memory_space<vmem>>, vector<1x128x128xbf16>
    %57 = vector.shape_cast %56 : vector<1x128x128xbf16> to vector<128x128xbf16>
    %cst_30 = arith.constant dense<0.000000e+00> : vector<16x128xf32>
    %58 = tpu.matmul %55, %57, %cst_30 {dimension_numbers = #tpu.dot_dimension_numbers<[1], [0], [0], [1], [0, 0, 1, 1], [], []>} : vector<16x128xbf16>, vector<128x128xbf16>, vector<16x128xf32> -> vector<16x128xf32>
    %59 = vector.broadcast %46 : vector<1x128xf32> to vector<16x128xf32>
    %60 = arith.addf %58, %59 : vector<16x128xf32>
    %61 = tpu.iota {dimensions = array<i32: 0>} : vector<8x16xi32>
    %c0_31 = arith.constant 0 : index
    %c0_32 = arith.constant 0 : index
    %62 = vector.load %arg7[%c0_31, %c0_32] : memref<1x16xi32, #tpu.memory_space<vmem>>, vector<1x16xi32>
    %63 = vector.broadcast %62 : vector<1x16xi32> to vector<8x16xi32>
    %64 = arith.cmpi eq, %61, %63 : vector<8x16xi32>
    %65 = arith.extui %64 : vector<8x16xi1> to vector<8x16xi32>
    %66 = arith.sitofp %65 : vector<8x16xi32> to vector<8x16xf32>
    %c2_i32 = arith.constant 2 : i32
    %67 = arith.cmpi slt, %arg0, %c2_i32 : i32
    %68 = arith.extui %67 : i1 to i32
    %c0_i32_33 = arith.constant 0 : i32
    %69 = arith.cmpi ne, %68, %c0_i32_33 : i32
    scf.if %69 {
      %cst_36 = arith.constant 0.000000e+00 : f32
      %73 = vector.broadcast %cst_36 : f32 to vector<16x128xf32>
      %74 = arith.maximumf %60, %73 : vector<16x128xf32>
      %75 = arith.addf %74, %12 : vector<16x128xf32>
      %c0_37 = arith.constant 0 : index
      %c0_38 = arith.constant 0 : index
      %76 = vector.load %arg16[%c0_37, %c0_38] : memref<16x128xf32, #tpu.memory_space<vmem>>, vector<16x128xf32>
      tpu.vector_store %arg16[%c0_37, %c0_38], %75 {strides = array<i32>} : memref<16x128xf32, #tpu.memory_space<vmem>>, vector<16x128xf32>,
      %cst_39 = arith.constant dense<0.000000e+00> : vector<8x128xf32>
      %77 = tpu.matmul %66, %12, %cst_39 {dimension_numbers = #tpu.dot_dimension_numbers<[1], [0], [0], [1], [0, 0, 1, 1], [], []>} : vector<8x16xf32>, vector<16x128xf32>, vector<8x128xf32> -> vector<8x128xf32>
      %c0_40 = arith.constant 0 : index
      %c2 = arith.constant 2 : index
      %c0_41 = arith.constant 0 : index
      %78 = vector.load %arg13[%c0_40, %c2, %c0_41] : memref<1x8x128xf32, #tpu.memory_space<vmem>>, vector<1x1x128xf32>
      %79 = vector.shape_cast %78 : vector<1x1x128xf32> to vector<1x128xf32>
      %c0_42 = arith.constant 0 : index
      %c3 = arith.constant 3 : index
      %c0_43 = arith.constant 0 : index
      %80 = vector.load %arg13[%c0_42, %c3, %c0_43] : memref<1x8x128xf32, #tpu.memory_space<vmem>>, vector<1x1x128xf32>
      %81 = vector.shape_cast %80 : vector<1x1x128xf32> to vector<1x128xf32>
      %82 = arith.addf %77, %4 : vector<8x128xf32>
      %83 = arith.truncf %82 : vector<8x128xf32> to vector<8x128xbf16>
      %c0_44 = arith.constant 0 : index
      %c0_45 = arith.constant 0 : index
      %c0_46 = arith.constant 0 : index
      %84 = vector.load %arg11[%c0_44, %c0_45, %c0_46] : memref<1x128x128xbf16, #tpu.memory_space<vmem>>, vector<1x128x128xbf16>
      %85 = vector.shape_cast %84 : vector<1x128x128xbf16> to vector<128x128xbf16>
      %cst_47 = arith.constant dense<0.000000e+00> : vector<8x128xf32>
      %86 = tpu.matmul %83, %85, %cst_47 {dimension_numbers = #tpu.dot_dimension_numbers<[1], [0], [0], [1], [0, 0, 1, 1], [], []>} : vector<8x128xbf16>, vector<128x128xbf16>, vector<8x128xf32> -> vector<8x128xf32>
      %87 = vector.broadcast %79 : vector<1x128xf32> to vector<8x128xf32>
      %88 = arith.addf %86, %87 : vector<8x128xf32>
      %cst_48 = arith.constant 0.000000e+00 : f32
      %89 = vector.broadcast %cst_48 : f32 to vector<8x128xf32>
      %90 = arith.maximumf %88, %89 : vector<8x128xf32>
      %91 = arith.truncf %90 : vector<8x128xf32> to vector<8x128xbf16>
      %c0_49 = arith.constant 0 : index
      %c0_50 = arith.constant 0 : index
      %c0_51 = arith.constant 0 : index
      %92 = vector.load %arg12[%c0_49, %c0_50, %c0_51] : memref<1x128x128xbf16, #tpu.memory_space<vmem>>, vector<1x128x128xbf16>
      %93 = vector.shape_cast %92 : vector<1x128x128xbf16> to vector<128x128xbf16>
      %cst_52 = arith.constant dense<0.000000e+00> : vector<8x128xf32>
      %94 = tpu.matmul %91, %93, %cst_52 {dimension_numbers = #tpu.dot_dimension_numbers<[1], [0], [0], [1], [0, 0, 1, 1], [], []>} : vector<8x128xbf16>, vector<128x128xbf16>, vector<8x128xf32> -> vector<8x128xf32>
      %95 = vector.broadcast %81 : vector<1x128xf32> to vector<8x128xf32>
      %96 = arith.addf %94, %95 : vector<8x128xf32>
      %cst_53 = arith.constant 0.000000e+00 : f32
      %97 = vector.broadcast %cst_53 : f32 to vector<8x128xf32>
      %98 = arith.maximumf %96, %97 : vector<8x128xf32>
      %c0_54 = arith.constant 0 : index
      %c0_55 = arith.constant 0 : index
      %99 = vector.load %arg17[%c0_54, %c0_55] : memref<8x128xf32, #tpu.memory_space<vmem>>, vector<8x128xf32>
      tpu.vector_store %arg17[%c0_54, %c0_55], %98 {strides = array<i32>} : memref<8x128xf32, #tpu.memory_space<vmem>>, vector<8x128xf32>,
    } else {
    }
    %c2_i32_34 = arith.constant 2 : i32
    %70 = arith.cmpi eq, %arg0, %c2_i32_34 : i32
    %71 = arith.extui %70 : i1 to i32
    %c0_i32_35 = arith.constant 0 : i32
    %72 = arith.cmpi ne, %71, %c0_i32_35 : i32
    scf.if %72 {
      %73 = arith.addf %60, %12 : vector<16x128xf32>
      %c0_36 = arith.constant 0 : index
      %c0_37 = arith.constant 0 : index
      %74 = vector.load %arg14[%c0_36, %c0_37] : memref<16x128xf32, #tpu.memory_space<vmem>>, vector<16x128xf32>
      tpu.vector_store %arg14[%c0_36, %c0_37], %73 {strides = array<i32>} : memref<16x128xf32, #tpu.memory_space<vmem>>, vector<16x128xf32>,
      %cst_38 = arith.constant dense<0.000000e+00> : vector<8x128xf32>
      %75 = tpu.matmul %66, %73, %cst_38 {dimension_numbers = #tpu.dot_dimension_numbers<[1], [0], [0], [1], [0, 0, 1, 1], [], []>} : vector<8x16xf32>, vector<16x128xf32>, vector<8x128xf32> -> vector<8x128xf32>
      %c0_39 = arith.constant 0 : index
      %c0_40 = arith.constant 0 : index
      %76 = vector.load %arg15[%c0_39, %c0_40] : memref<8x128xf32, #tpu.memory_space<vmem>>, vector<8x128xf32>
      tpu.vector_store %arg15[%c0_39, %c0_40], %75 {strides = array<i32>} : memref<8x128xf32, #tpu.memory_space<vmem>>, vector<8x128xf32>,
    } else {
    }
    return
  }
  func.func @transform_0(%arg0: i32) -> i32 {
    %c0_i32 = arith.constant 0 : i32
    %c0_i32_0 = arith.constant 0 : i32
    return %c0_i32 : i32
  }
  func.func @transform_1(%arg0: i32) -> (i32, i32) {
    %c0_i32 = arith.constant 0 : i32
    %c0_i32_0 = arith.constant 0 : i32
    %c0_i32_1 = arith.constant 0 : i32
    return %c0_i32, %c0_i32_0 : i32, i32
  }
  func.func @transform_2(%arg0: i32) -> (i32, i32) {
    %c0_i32 = arith.constant 0 : i32
    %c0_i32_0 = arith.constant 0 : i32
    %c0_i32_1 = arith.constant 0 : i32
    return %c0_i32, %c0_i32_0 : i32, i32
  }
  func.func @transform_3(%arg0: i32) -> (i32, i32) {
    %c0_i32 = arith.constant 0 : i32
    %c0_i32_0 = arith.constant 0 : i32
    %c0_i32_1 = arith.constant 0 : i32
    return %c0_i32, %c0_i32_0 : i32, i32
  }
  func.func @transform_4(%arg0: i32) -> (i32, i32) {
    %c0_i32 = arith.constant 0 : i32
    %c0_i32_0 = arith.constant 0 : i32
    %c0_i32_1 = arith.constant 0 : i32
    return %c0_i32, %c0_i32_0 : i32, i32
  }
  func.func @transform_5(%arg0: i32) -> (i32, i32) {
    %c0_i32 = arith.constant 0 : i32
    %c0_i32_0 = arith.constant 0 : i32
    %c0_i32_1 = arith.constant 0 : i32
    return %c0_i32, %c0_i32_0 : i32, i32
  }
  func.func @transform_6(%arg0: i32) -> (i32, i32) {
    %c0_i32 = arith.constant 0 : i32
    %c0_i32_0 = arith.constant 0 : i32
    %c0_i32_1 = arith.constant 0 : i32
    return %c0_i32, %c0_i32_0 : i32, i32
  }
  func.func @transform_7(%arg0: i32) -> (i32, i32, i32) {
    %c0_i32 = arith.constant 0 : i32
    %c0_i32_0 = arith.constant 0 : i32
    %c0_i32_1 = arith.constant 0 : i32
    return %arg0, %c0_i32, %c0_i32_0 : i32, i32, i32
  }
  func.func @transform_8(%arg0: i32) -> (i32, i32, i32) {
    %c0_i32 = arith.constant 0 : i32
    %c0_i32_0 = arith.constant 0 : i32
    %c0_i32_1 = arith.constant 0 : i32
    return %arg0, %c0_i32, %c0_i32_0 : i32, i32, i32
  }
  func.func @transform_9(%arg0: i32) -> (i32, i32, i32) {
    %c0_i32 = arith.constant 0 : i32
    %c0_i32_0 = arith.constant 0 : i32
    %c0_i32_1 = arith.constant 0 : i32
    return %arg0, %c0_i32, %c0_i32_0 : i32, i32, i32
  }
  func.func @transform_10(%arg0: i32) -> (i32, i32, i32) {
    %c1_i32 = arith.constant 1 : i32
    %0 = arith.minsi %arg0, %c1_i32 : i32
    %c0_i32 = arith.constant 0 : i32
    %c0_i32_0 = arith.constant 0 : i32
    %c0_i32_1 = arith.constant 0 : i32
    return %0, %c0_i32, %c0_i32_0 : i32, i32, i32
  }
  func.func @transform_11(%arg0: i32) -> (i32, i32, i32) {
    %c1_i32 = arith.constant 1 : i32
    %0 = arith.minsi %arg0, %c1_i32 : i32
    %c0_i32 = arith.constant 0 : i32
    %c0_i32_0 = arith.constant 0 : i32
    %c0_i32_1 = arith.constant 0 : i32
    return %0, %c0_i32, %c0_i32_0 : i32, i32, i32
  }
  func.func @transform_12(%arg0: i32) -> (i32, i32, i32) {
    %c0_i32 = arith.constant 0 : i32
    %c0_i32_0 = arith.constant 0 : i32
    %c0_i32_1 = arith.constant 0 : i32
    return %arg0, %c0_i32, %c0_i32_0 : i32, i32, i32
  }
  func.func @transform_13(%arg0: i32) -> (i32, i32) {
    %c0_i32 = arith.constant 0 : i32
    %c0_i32_0 = arith.constant 0 : i32
    %c0_i32_1 = arith.constant 0 : i32
    return %c0_i32, %c0_i32_0 : i32, i32
  }
  func.func @transform_14(%arg0: i32) -> (i32, i32) {
    %c0_i32 = arith.constant 0 : i32
    %c0_i32_0 = arith.constant 0 : i32
    %c0_i32_1 = arith.constant 0 : i32
    return %c0_i32, %c0_i32_0 : i32, i32
  }
}

</mosaic_0001>

<bundles_post_ra>
// kernel: tpu_custom_call.1
= control target key start
LH: loop header
LB: loop body
LE: loop exit
PB: predicated region body
PF: predicated region fallthrough
CT: control target
= control target key end

     0   :  { %s2744_s0 = inlined_call_operand.vmem [shape: f32[3], index: 0, kind: input, shape index: {}]   ;;  %s2745_s1 = inlined_call_operand.hbm [shape: f32[16,128], index: 1, kind: input, shape index: {}]   ;;  %s2746_s2 = inlined_call_operand.hbm [shape: f32[8,128], index: 2, kind: input, shape index: {}]   ;;  %s2747_s3 = inlined_call_operand.vmem [shape: s32[32,1], index: 3, kind: input, shape index: {}]   ;;  %s2748_s4 = inlined_call_operand.vmem [shape: s32[1,32], index: 4, kind: input, shape index: {}]   ;;  %s2749_s5 = inlined_call_operand.vmem [shape: s32[16,1], index: 5, kind: input, shape index: {}]   ;;  %s2750_s6 = inlined_call_operand.vmem [shape: s32[1,16], index: 6, kind: input, shape index: {}]   ;;  %s2751_s7 = inlined_call_operand.vmem [shape: bf16[3,32,128], index: 7, kind: input, shape index: {}]   ;;  %s2752_s8 = inlined_call_operand.hbm [shape: bf16[3,128,128], index: 8, kind: input, shape index: {}]   ;;  %s2753_s9 = inlined_call_operand.hbm [shape: bf16[3,128,128], index: 9, kind: input, shape index: {}]   ;;  %s2754_s10 = inlined_call_operand.hbm [shape: bf16[2,128,128], index: 10, kind: input, shape index: {}]   ;;  %s2755_s11 = inlined_call_operand.hbm [shape: bf16[2,128,128], index: 11, kind: input, shape index: {}]   ;;  %s2756_s12 = inlined_call_operand.hbm [shape: f32[3,8,128], index: 12, kind: input, shape index: {}]   ;;  %s2757_s13 = inlined_call_operand.hbm [shape: f32[16,128], index: 13, kind: output, shape index: {0}]   ;;  %s2758_s14 = inlined_call_operand.hbm [shape: f32[8,128], index: 14, kind: output, shape index: {1}]  }
   0x1   :  { %2776 = sst [smem:[#allocation32_spill]] %s2745_s1 }
   0x2   :  { %2777 = sst [smem:[#allocation33_spill]] %s2747_s3 }
   0x3   :  { %2778 = sst [smem:[#allocation34_spill]] %s2748_s4 }
   0x4   :  { %2779 = sst [smem:[#allocation35_spill]] %s2749_s5 }
   0x5   :  { %2780 = sst [smem:[#allocation36_spill]] %s2750_s6 }
   0x6   :  { %2781 = sst [smem:[#allocation37_spill]] %s2751_s7 }
   0x7   :  { %2782 = sst [smem:[#allocation38_spill]] %s2752_s8 }
   0x8   :  { %2783 = sst [smem:[#allocation39_spill]] %s2753_s9 }
   0x9   :  { %2784 = sst [smem:[#allocation40_spill]] %s2757_s13 }
   0xa   :  { %2785 = sst [smem:[#allocation41_spill]] %s2758_s14 }
   0xb   :  { %20 = vsyncpa [#allocation7], 0 }
   0xc   :  { %21 = vsyncpa [#allocation5], 0 }
   0xd   :  { %22 = vsyncpa [#allocation10], 0 }
   0xe   :  { %23 = vsyncpa [#allocation6], 0 }
   0xf   :  { %24 = vsyncpa [#allocation18], 0  ;;  %s2314_s29 = smov 0   ;;  %s2316_s30 = smov 0  }
  0x10   :  { %s2318_s15 = smov 0   ;;  %s2320_s16 = smov 0  }
  0x11   :  { %s2322_s17 = smov 0   ;;  %s2324_s18 = smov 0  }
  0x12   :  { %s2326_s19 = smov 0  }
  0x13 LB: > { %s2346_s20 = sadd.s32 4294967295, %s2224_s19   ;;  %p223_p0 = scmp.ne.s32.totalorder %s2216_s17, %s2212_s16  ;;  %s2224_s19 = sphi %s2326_s19, %s2823_s19   ;;  %s2220_s18 = sphi %s2324_s18, %s2831_s18   ;;  %s2216_s17 = sphi %s2322_s17, %s2830_s17   ;;  %s2212_s16 = sphi %s2320_s16, %s2829_s16   ;;  %s2208_s15 = sphi %s2318_s15, %s2828_s15   ;;  %s2204_s30 = sphi %s2316_s30, %s2827_s30   ;;  %s2200_s29 = sphi %s2314_s29, %s2826_s29  }
  0x14   : > { %p2763_p1 = scmp.eq.s32.totalorder %s2346_s20, 0  ;;  %p279_p2 = scmp.ne.s32.totalorder %s2204_s30, %s2200_s29 }
  0x15   : > { %p1483_p3 = scmp.ge.s32.totalorder %s2224_s19, 1  ;;  %p388_p4 = scmp.lt.s32.totalorder %s2224_s19, 4 }
  0x16   : > { %p2355_p5 = por %p2763_p1, %p223_p0  ;;  %p2361_p6 = por %p279_p2, %p2763_p1 }
  0x17   : > { %p2365_p7 = pnand %p1483_p3, %p388_p4  ;;  %s2791_s1 = sld [smem:[#allocation32_spill]] }
  0x18   : > { %s2786_s21 = scalar_select %p2355_p5, 1, 0 }
  0x19   : > { %s2788_s22 = scalar_select %p2361_p6, 1, 0 }
  0x1a   : > { %2787 = sst [smem:[#allocation27_spill]] %s2786_s21  ;;  %p1742_p9 = pneg %p2365_p7 }
  0x1b   : > { %2789 = sst [smem:[#allocation28_spill]] %s2788_s22  ;;  %s2226_s27 = smov [#allocation8]  }
  0x1c   : > { %s411_s28 = sshll.u32 %s2226_s27, 4  ;;  %p2377_p10 = pnand %p1742_p9, %p2763_p1  ;;  %s412_s28 = int_to_ptr.vmem [resolvable:$true] %s411_s28 }
  0x1d   : > { %s409_s26 = sshll.u32 %s2791_s1, 4  ;;  %s2227_s16 = smov 128   ;;  %s410_s26 = int_to_ptr.hbm [resolvable:$true] %s409_s26 }
  0x1e   : > { %s2228_s24 = smov 8   ;;  %p218_p11 = scmp.eq.s32.totalorder %s2224_s19, 0 }
  0x1f   : > { %1748 = dma.hbm_to_vmem [thread:$0]  (!%p2377_p10), %s410_s26, 256, %s412_s28, [#allocation5], %s2227_s16, %s2227_s16, %s2228_s24  }
  0x20   : > { %p217_p12 = scmp.ne.s32.totalorder %s2220_s18, %s2216_s17  ;;  %p2764_p13 = scmp.lt.s32.totalorder %s2224_s19, 3 }
  0x21   : > { %s457_s1 = sand.u32 1, %s2224_s19   ;;  %s2760_s27 = sand.u32 1, %s2220_s18  }
  0x22   : > { %p219_p0 = por %p218_p11, %p217_p12  ;;  %s2762_s14 = sshll.u32 %s2224_s19, 6 }
  0x23   : > { %s2395_s13 = sshll.u32 %s2760_s27, 6  ;;  %s2793_s8 = sld [smem:[#allocation38_spill]] }
  0x24   : > { %s461_s28 = scalar_lea.vmem [#allocation11], %s2395_s13  ;;  %p2405_p2 = pnand %p2764_p13, %p219_p0 }
  0x25   : > { %s469_s16 = sshll.u32 %s461_s28, 4  ;;  %s2409_s27 = scalar_lea.sflag [#allocation5], %s457_s1  ;;  %s470_s16 = int_to_ptr.vmem [resolvable:$true] %s469_s16 }
  0x26   : > { %p2775_p4 = pneg %p2405_p2 }
  0x29   : > { %s466_s3 = scalar_lea.hbm %s2793_s8, %s2762_s14  ;;  %s1894_s6 = scalar_lea.hbm %s2793_s8, 192 }
  0x2a   : > { %s467_s26 = sshll.u32 %s466_s3, 4  ;;  %s468_s26 = int_to_ptr.hbm [resolvable:$true] %s467_s26 }
  0x2b   : > { %s1887_s25 = sshra.s32 %s468_s26, 4  ;;  %s1888_s25 = int_to_ptr.hbm [resolvable:$true] %s1887_s25 }
  0x2c   : > { %s1889_s5 = scalar_lea.hbm %s1888_s25, 64  ;;  %p1895_p0 = scmp.lt.s32.totalorder %s1888_s25, %s2793_s8 }
  0x2d   : > { %p1890_p3 = scmp.ne.s32.totalorder %s1888_s25, %s1889_s5  ;;  %p1896_p8 = scmp.lt.s32.totalorder %s1894_s6, %s1889_s5 }
  0x2f   : > { %p1892_p9 = pnand %p2775_p4, %p1890_p3  ;;  %p1897_p1 = por %p1896_p8, %p1895_p0 }
  0x31   : > { %p1893_p12 = pneg %p1892_p9 }
  0x33   : > { %p1898_p13 = pnand %p1897_p1, %p1893_p12 }
  0x35   : > { %1901 = shalt.err (!%p1898_p13)
}
  0x36   : > { %s2769_s1 = smov 64   ;;  %s2771_s7 = smov 4  }
  0x37   : > { %1755 = dma.hbm_to_vmem [thread:$0]  (!%p2405_p2), %s468_s26, 1024, %s470_s16, %s2409_s27, %s2769_s1, %s2769_s1, %s2771_s7  }
  0x38   : > { %s2795_s3 = sshll.u32 %s2224_s19, 6  ;;  %s2796_s9 = sld [smem:[#allocation39_spill]] }
  0x39   : > { %s483_s25 = scalar_lea.vmem [#allocation12], %s2395_s13 }
  0x3a   : > { %s491_s6 = sshll.u32 %s483_s25, 4  ;;  %s492_s6 = int_to_ptr.vmem [resolvable:$true] %s491_s6 }
  0x3e   : > { %s488_s5 = scalar_lea.hbm %s2796_s9, %s2795_s3  ;;  %s1924_s16 = scalar_lea.hbm %s2796_s9, 192 }
  0x3f   : > { %s489_s28 = sshll.u32 %s488_s5, 4  ;;  %s490_s28 = int_to_ptr.hbm [resolvable:$true] %s489_s28 }
  0x40   : > { %s1917_s8 = sshra.s32 %s490_s28, 4  ;;  %s1918_s8 = int_to_ptr.hbm [resolvable:$true] %s1917_s8 }
  0x41   : > { %s1919_s22 = scalar_lea.hbm %s1918_s8, 64  ;;  %p1925_p3 = scmp.lt.s32.totalorder %s1918_s8, %s2796_s9 }
  0x42   : > { %p1920_p1 = scmp.ne.s32.totalorder %s1918_s8, %s1919_s22  ;;  %p1926_p9 = scmp.lt.s32.totalorder %s1924_s16, %s1919_s22 }
  0x44   : > { %p1922_p8 = pnand %p1920_p1, %p2775_p4  ;;  %p1927_p12 = por %p1926_p9, %p1925_p3 }
  0x46   : > { %p1923_p13 = pneg %p1922_p8 }
  0x48   : > { %p1928_p0 = pnand %p1927_p12, %p1923_p13 }
  0x4a   : > { %1931 = shalt.err (!%p1928_p0)
}
  0x4b   : > { %s2797_s13 = smov 64   ;;  %s2450_s8 = sadd.s32 1, %s2224_s19  }
  0x4c   : > { %1758 = dma.hbm_to_vmem [thread:$0]  (!%p2405_p2), %s490_s28, 1024, %s492_s6, %s2409_s27, %s2797_s13, %s2797_s13, %s2771_s7  }
  0x4d   : > { %2798 = sst [smem:[#allocation29_spill]] %s2450_s8  ;;  %s207_s21 = ssub.s32 %s2224_s19, %s2450_s8 }
  0x4e   : > { %p259_p1 = scmp.lt.s32.totalorder %s2224_s19, 1  ;;  %p208_p8 = scmp.eq.s32.totalorder %s207_s21, 0 }
  0x4f   : > { %p261_p13 = scmp.lt.s32.totalorder %s2450_s8, 1  ;;  %s2799_s1 = sadd.s32 1, %s2220_s18 }
  0x50   : > { %s260_s22 = scalar_select %p259_p1, %s2224_s19, 1 }
  0x51   : > { %s2460_s3 = scalar_select %p208_p8, %s2220_s18, %s2799_s1  }
  0x52   : > { %s262_s14 = scalar_select %p261_p13, %s2450_s8, 1 }
  0x53   : > { %2800 = sst [smem:[#allocation30_spill]] %s2460_s3  ;;  %s266_s5 = sadd.s32 1, %s2208_s15 }
  0x54   : > { %p273_p3 = scmp.ne.s32.totalorder %s2208_s15, %s2204_s30  ;;  %s263_s25 = ssub.s32 %s260_s22, %s262_s14 }
  0x55   : > { %s503_s6 = sand.u32 1, %s2208_s15   ;;  %p264_p9 = scmp.eq.s32.totalorder %s263_s25, 0 }
  0x56   : > { %p275_p12 = por %p273_p3, %p218_p11  ;;  %s1494_s28 = sshll.u32 %s503_s6, 6 }
  0x57   : > { %s1668_s26 = sshll.u32 %s260_s22, 6  ;;  %s505_s1 = scalar_lea.vmem [#allocation13], %s1494_s28 }
  0x58   : > { %s2470_s16 = scalar_select %p264_p9, %s2208_s15, %s266_s5  }
  0x59   : > { %s512_s7 = scalar_lea.hbm %s2754_s10, %s1668_s26  ;;  %s515_s3 = sshll.u32 %s505_s1, 4  ;;  %s516_s3 = int_to_ptr.vmem [resolvable:$true] %s515_s3 }
  0x5a   : > { %2801 = sst [smem:[#allocation31_spill]] %s2470_s16  ;;  %s513_s9 = sshll.u32 %s512_s7, 4  ;;  %s514_s9 = int_to_ptr.hbm [resolvable:$true] %s513_s9 }
  0x5b   : > { %p2802_p0 = scmp.lt.s32.totalorder %s2224_s19, 3  ;;  %s536_s22 = scalar_lea.hbm %s2755_s11, %s1668_s26 }
  0x5c   : > { %s529_s5 = scalar_lea.vmem [#allocation14], %s1494_s28  ;;  %s537_s4 = sshll.u32 %s536_s22, 4  ;;  %s538_s4 = int_to_ptr.hbm [resolvable:$true] %s537_s4 }
  0x5d   : > { %p2477_p1 = pnand %p2802_p0, %p275_p12  ;;  %s2484_s6 = sshll.u32 %s529_s5, 4  ;;  %s540_s6 = int_to_ptr.vmem [resolvable:$true] %s2484_s6 }
  0x5e   : > { %s1947_s7 = sshra.s32 %s514_s9, 4  ;;  %s1954_s8 = scalar_lea.hbm %s2754_s10, 128  ;;  %s1948_s7 = int_to_ptr.hbm [resolvable:$true] %s1947_s7 }
  0x5f   : > { %s1949_s21 = scalar_lea.hbm %s1948_s7, 64  ;;  %p1951_p8 = pneg %p2477_p1 }
  0x60   : > { %p1950_p11 = scmp.ne.s32.totalorder %s1948_s7, %s1949_s21  ;;  %p1955_p9 = scmp.lt.s32.totalorder %s1948_s7, %s2754_s10 }
  0x61   : > { %p1956_p12 = scmp.lt.s32.totalorder %s1954_s8, %s1949_s21 }
  0x62   : > { %p1952_p13 = pnand %p1951_p8, %p1950_p11 }
  0x63   : > { %p1957_p0 = por %p1956_p12, %p1955_p9 }
  0x64   : > { %p1953_p3 = pneg %p1952_p13 }
  0x66   : > { %p1958_p4 = pnand %p1957_p0, %p1953_p3 }
  0x68   : > { %1961 = shalt.err (!%p1958_p4)
}
  0x69   : > { %s2804_s28 = smov 4   ;;  %s1977_s16 = sshra.s32 %s538_s4, 4  ;;  %s1978_s16 = int_to_ptr.hbm [resolvable:$true] %s1977_s16 }
  0x6a   : > { %1761 = dma.hbm_to_vmem [thread:$0]  (!%p2477_p1), %s514_s9, 1024, %s516_s3, %s2409_s27, %s2797_s13, %s2797_s13, %s2804_s28  }
  0x6b   : > { %s1979_s22 = scalar_lea.hbm %s1978_s16, 64  ;;  %s1984_s21 = scalar_lea.hbm %s2755_s11, 128 }
  0x6c   : > { %p1980_p11 = scmp.ne.s32.totalorder %s1978_s16, %s1979_s22  ;;  %p1985_p4 = scmp.lt.s32.totalorder %s1978_s16, %s2755_s11 }
  0x6d   : > { %p1986_p9 = scmp.lt.s32.totalorder %s1984_s21, %s1979_s22 }
  0x6e   : > { %p1982_p13 = pnand %p1980_p11, %p1951_p8 }
  0x6f   : > { %p1987_p12 = por %p1986_p9, %p1985_p4 }
  0x70   : > { %p1983_p3 = pneg %p1982_p13 }
  0x72   : > { %p1988_p0 = pnand %p1987_p12, %p1983_p3 }
  0x74   : > { %1991 = shalt.err (!%p1988_p0)
}
  0x75   : > { %1764 = dma.hbm_to_vmem [thread:$0]  (!%p2477_p1), %s538_s4, 1024, %s540_s6, %s2409_s27, %s2797_s13, %s2797_s13, %s2804_s28  }
  0x76   : > { %s400_s25 = sshll.u32 %s2744_s0, 4  ;;  %s424_s22 = sshll.u32 %s2746_s2, 4  ;;  %s401_s25 = int_to_ptr.vmem [resolvable:$true] %s400_s25  ;;  %s425_s22 = int_to_ptr.hbm [resolvable:$true] %s424_s22 }
  0x77   : > { %s2231_s5 = smov [#allocation4]   ;;  %s2232_s14 = smov [#allocation9]  }
  0x78   : > { %1745 = dma.vmem_to_smem (!%p2377_p10), %s401_s25, 16, %s2231_s5, [#allocation7]  }
  0x79   : > { %s426_s7 = sshll.u32 %s2232_s14, 4  ;;  %s2805_s21 = sand.u32 1, %s2220_s18   ;;  %s427_s7 = int_to_ptr.vmem [resolvable:$true] %s426_s7 }
  0x7a   : > { %s1500_s1 = sshll.u32 %s2805_s21, 3  ;;  %s1501_s13 = sshll.u32 %s2224_s19, 3 }
  0x7b   : > { %1751 = dma.hbm_to_vmem [thread:$0]  (!%p2377_p10), %s425_s22, 128, %s427_s7, [#allocation10]  }
  0x7c   : > { %s553_s6 = scalar_lea.vmem [#allocation15], %s1500_s1  ;;  %s557_s9 = scalar_lea.hbm %s2756_s12, %s1501_s13 }
  0x7d   : > { %s561_s4 = sshll.u32 %s553_s6, 4  ;;  %s559_s3 = sshll.u32 %s557_s9, 4  ;;  %s562_s4 = int_to_ptr.vmem [resolvable:$true] %s561_s4  ;;  %s560_s3 = int_to_ptr.hbm [resolvable:$true] %s559_s3 }
  0x7e   : > { %s2052_s25 = sshra.s32 %s560_s3, 4  ;;  %p2806_p8 = pneg %p2405_p2  ;;  %s2053_s25 = int_to_ptr.hbm [resolvable:$true] %s2052_s25 }
  0x7f   : > { %s2054_s26 = scalar_lea.hbm %s2053_s25, 8  ;;  %s2059_s19 = scalar_lea.hbm %s2756_s12, 24 }
  0x80   : > { %p2055_p1 = scmp.ne.s32.totalorder %s2053_s25, %s2054_s26  ;;  %p2060_p10 = scmp.lt.s32.totalorder %s2053_s25, %s2756_s12 }
  0x81   : > { %p2061_p3 = scmp.lt.s32.totalorder %s2059_s19, %s2054_s26 }
  0x82   : > { %p2057_p11 = pnand %p2055_p1, %p2806_p8 }
  0x83   : > { %p2062_p4 = por %p2061_p3, %p2060_p10 }
  0x84   : > { %p2058_p13 = pneg %p2057_p11 }
  0x86   : > { %p2063_p9 = pnand %p2062_p4, %p2058_p13 }
  0x88   : > { %2066 = shalt.err (!%p2063_p9)
}
  0x89   : > { %1767 = dma.hbm_to_vmem [thread:$0]  (!%p2405_p2), %s560_s3, 128, %s562_s4, %s2409_s27  }
  0x8a   : > { %570 = sbr.rel (%p2365_p7) target bundleno = 1594 (0x63a), region = 72  ;;  %p2807_p12 = scmp.eq.s32.totalorder (!%p2365_p7), %s2346_s20, 0 }
  0x8f   : > { %2167 = dma.done.wait (%p2807_p12), [#allocation7], 16   ;;  %p2808_p0 = pmov %p2807_p12 }
  0x91   : > { %2169 = vsyncadd (%p2808_p0), [#allocation7], 4294967280  ;;  %p2809_p1 = pmov %p2808_p0 }
  0x92   : > { %p2810_p8 = pmov %p2808_p0 }
  0x93   : > { %2171 = dma.done.wait (%p2809_p1), [#allocation5], 256  }
  0x94   : > { %2173 = vsyncadd (%p2810_p8), [#allocation5], 4294967040  ;;  %p2811_p11 = pmov %p2808_p0 }
  0x95   : > { %p2812_p2 = pmov %p2808_p0 }
  0x96   : > { %2175 = dma.done.wait (%p2811_p11), [#allocation10], 128  }
  0x97   : > { %2177 = vsyncadd (%p2812_p2), [#allocation10], 4294967168  ;;  %s587_s27 = sand.u32 1, %s2346_s20   ;;  %s589_s24 = sand.u32 1, %s2216_s17  }
  0x98   : > { %s1506_s14 = sshll.u32 %s589_s24, 6  ;;  %s588_s7 = scalar_lea.sflag [#allocation5], %s587_s27 }
  0x99   : > { %s2563_s21 = scalar_lea.vmem [#allocation11], %s1506_s14 }
  0x9a   : > { %2179 = dma.done.wait (%p2355_p5), %s588_s7, 2048  }
  0x9b   : > { %2181 = vsyncadd (%p2355_p5), %s588_s7, 4294965248  ;;  %s609_s13 = sand.u32 1, %s2204_s30   ;;  %s2570_s4 = scalar_lea.vmem [#allocation12], %s1506_s14 }
  0x9c   : > { %s1508_s6 = sshll.u32 %s609_s13, 6 }
  0x9d   : > { %s2572_s28 = scalar_lea.vmem [#allocation13], %s1508_s6 }
  0x9e   : > { %2183 = dma.done.wait (%p2361_p6), %s588_s7, 2048  }
  0x9f   : > { %2185 = vsyncadd (%p2361_p6), %s588_s7, 4294965248  ;;  %s1510_s8 = sshll.u32 %s589_s24, 3  ;;  %s2578_s9 = scalar_lea.vmem [#allocation14], %s1508_s6 }
  0xa0   : > { %s2580_s3 = scalar_lea.vmem [#allocation15], %s1510_s8 }
  0xa1   : > { %2187 = dma.done.wait (%p2355_p5), %s588_s7, 128  }
  0xa2   : > { %2189 = vsyncadd (%p2355_p5), %s588_s7, 4294967168 }
  0xa3   : > { %637 = sfence }
  0xa4   : > { %p698_p7 = scmp.lt.s32.totalorder %s2346_s20, 2  ;;  %s2815_s19 = sld [smem:[#allocation37_spill]] }
  0xa5   : > { %p2816_p6 = scmp.ne.s32.totalorder %s2346_s20, 0 }
  0xa6   : > { %s699_s25 = scalar_select %p698_p7, %s2346_s20, 2 }
  0xa7   : > { %711 = sbr.rel (%p2816_p6) target bundleno = 176 (0xb0), region = 108 }
  0xa8   : > { %s1670_s26 = sshll.u32 %s699_s25, 4 }
  0xaa   : > { %s2591_s22 = scalar_lea.vmem %s2815_s19, %s1670_s26 }
  0xac   : > { %v712_v0 = vld [vmem:[#allocation8] sm:$0xff]  ;;  %v713_v1 = vld [vmem:[#allocation8 + $0x8] sm:$0xff]  ;;  %v716_v2 = vld [vmem:[#allocation9] sm:$0xff] }
  0xad   : > { %714 = vst [vmem:[#allocation2] sm:$0xff] %v712_v0 }
  0xae   : > { %715 = vst [vmem:[#allocation2 + $0x8] sm:$0xff] %v713_v1 }
  0xaf   : > { %717 = vst [vmem:[#allocation3] sm:$0xff] %v716_v2 }
  0xb0 PF: > { %s2817_s27 = sld [smem:[#allocation35_spill]]  ;;  %v2233_v4 = vmov 0   ;;  %v721_v11 = vlaneseq  ;;  %vm737_vm0 = vcmask 64512   ;;  %v2234_v14 = vmov 0.0   ;;  %v1678_v38 = vld [vmem:[%s2563_s21 + $0x38] sm:$0xff]  ;;  %v1677_v40 = vld [vmem:[%s2563_s21 + $0x30] sm:$0xff] }
  0xb1   : > { %1848 = vset.pattern.permute.xlu0 %v2233_v4  ;;  %1849 = vset.pattern.permute.xlu1 %v2233_v4  ;;  %s2818_s13 = sld [smem:[#allocation33_spill]]  ;;  %vm808_vm5 = vcmask 130048   ;;  %v1676_v42 = vld [vmem:[%s2563_s21 + $0x28] sm:$0xff]  ;;  %v1711_v43 = vld [vmem:[%s2591_s22 + $0x8] sm:$0xff]   ;;  %v1675_v45 = vld [vmem:[%s2563_s21 + $0x20] sm:$0xff]  ;;  %vm852_vm11 = vcmask 261120  }
  0xb2   : > { %1850 = vset.pattern.permute.xlu2 %v2233_v4  ;;  %v722_v12 = vand.u32 127, %v721_v11  ;;  %v839_v36 = vshrl.u32 %v721_v11, 7  ;;  %s2819_s23 = sld [smem:[#allocation36_spill]]  ;;  %945 = vmatpush.bf16.msra.mxu3 %v1678_v38  ;;  %v1709_v46 = vunpack.c.l.bf16 %v1711_v43  ;;  %v1704_v47 = vld [vmem:[%s2591_s22] sm:$0xff]   ;;  %v1674_v48 = vld [vmem:[%s2563_s21 + $0x18] sm:$0xff]  ;;  %v1710_v50 = vunpack.c.h.bf16 %v1711_v43  ;;  %v1683_v11 = vld [vmem:[%s2570_s4 + $0x20] sm:$0xff] }
  0xb3   : > { %v1706_v49 = vunpack.c.h.bf16 %v1704_v47  ;;  %v1705_v51 = vunpack.c.l.bf16 %v1704_v47  ;;  %s2820_s7 = sld [smem:[#allocation34_spill]]  ;;  %v1673_v4 = vld [vmem:[%s2563_s21 + $0x10] sm:$0xff]  ;;  %p1592_p5 = scmp.ge.s32.totalorder %s2346_s20, 2 }
  0xb4   : > { %v718_v21 = vld [vmem:[#allocation2] sm:$0xff]  ;;  %v840_v54 = vadd.s32 8, %v839_v36  ;;  %s870_s22 = sld [smem:[#allocation4 + %s2346_s20]] }
  0xb5   : > { %v719_v22 = vld [vmem:[#allocation2 + $0x8] sm:$0xff] }
  0xb6   : > { %v723_v3 = vld [vmem:[%s2817_s27] sm:$0xff]  ;;  %v724_v5 = vld [vmem:[%s2817_s27 + $0x8] sm:$0xff]  ;;  %v2601_v6 = vld [vmem:[#allocation3] sm:$0xff]  ;;  %946 = vmatpush.bf16.msra.mxu3 %v1677_v40 }
  0xb7   : > { %726 = vperm.xlu0 %1848, %v723_v3   ;;  %759 = vmatpush.msra.mxu2 %v2601_v6  ;;  %v770_v7 = vld [vmem:[%s2818_s13] sm:$0xff]  ;;  %v772_v8 = vld [vmem:[%s2818_s13 + $0x10] sm:$0xff]  ;;  %v771_v9 = vld [vmem:[%s2818_s13 + $0x8] sm:$0xff] }
  0xb8   : > { %775 = vperm.xlu1 %1849, %v770_v7   ;;  %781 = vperm.xlu2 %1850, %v772_v8   ;;  %v773_v10 = vld [vmem:[%s2818_s13 + $0x18] sm:$0xff]  ;;  %v1852_v37 = vld [vmem:[%s2819_s23] ss:$0 sm:$0xff]  ;;  %v1671_v7 = vld [vmem:[%s2563_s21] sm:$0xff] }
  0xb9   : > { %vm1043_vm8 = vcmp.eq.s32.totalorder %v839_v36, %v1852_v37  ;;  %v1851_v55 = vld [vmem:[%s2820_s7] ss:$0 sm:$0xff]  ;;  %v1686_v8 = vld [vmem:[%s2570_s4 + $0x38] sm:$0xff] }
  0xba   : > { %v2636_v41 = vsel %vm1043_vm8, 1.0, %v2234_v14  ;;  %947 = vmatpush.bf16.msra.mxu3 %v1676_v42  ;;  %vm843_vm9 = vcmp.eq.s32.totalorder %v839_v36, %v1851_v55  ;;  %vm844_vm10 = vcmp.eq.s32.totalorder %v840_v54, %v1851_v55  ;;  %1027 = vmatpush.bf16.msra.mxu0 %v1686_v8  ;;  %s871_s1 = sadd.f32 1.0, %s870_s22 }
  0xbb   : > { %v1524_v0 = vsel %vm843_vm9, 1.0, %v2234_v14  ;;  %v1525_v1 = vsel %vm844_vm10, 1.0, %v2234_v14 }
  0xbc   : > { %v849_v3 = vpack.c.bf16 %v1525_v1, %v1524_v0 }
  0xbe   : > { %948 = vmatpush.bf16.msra.mxu3 %v1675_v45 }
  0xbf   : > { %729 = vperm.xlu0 %1848, %v724_v5   ;;  %v1672_v5 = vld [vmem:[%s2563_s21 + $0x8] sm:$0xff] }
  0xc0   : > { %778 = vperm.xlu1 %1849, %v771_v9   ;;  %784 = vperm.xlu2 %1850, %v773_v10   ;;  %v1685_v9 = vld [vmem:[%s2570_s4 + $0x30] sm:$0xff]  ;;  %v1684_v10 = vld [vmem:[%s2570_s4 + $0x28] sm:$0xff] }
  0xc1   : > { %1028 = vmatpush.bf16.msra.mxu0 %v1685_v9 }
  0xc2   : > { %949 = vmatpush.bf16.msra.mxu3 %v1674_v48 }
  0xc5   : > { %1029 = vmatpush.bf16.msra.mxu0 %v1684_v10 }
  0xc6   : > { %950 = vmatpush.bf16.msra.mxu3 %v1673_v4 }
  0xc9   : > { %1030 = vmatpush.bf16.msra.mxu0 %v1683_v11 }
  0xca   : > { %951 = vmatpush.bf16.msra.mxu3 %v1672_v5 }
  0xce   : > { %952 = vmatpush.bf16.msra.mxu3 %v1671_v7 }
 0x112   : > { %v782_v28 = vpop.permute.xlu2 %781 }
 0x113   : > { %vm788_vm6 = vcmp.eq.s32.totalorder %v722_v12, %v782_v28 }
 0x114   : > { %v1520_v32 = vsel %vm788_vm6, 1.0, %v2234_v14 }
 0x11a   : > { %v785_v31 = vpop.permute.xlu2 %784 }
 0x11b   : > { %vm789_vm7 = vcmp.eq.s32.totalorder %v722_v12, %v785_v31 }
 0x11c   : > { %v1521_v33 = vsel %vm789_vm7, 1.0, %v2234_v14 }
 0x11d   : > { %v799_v34 = vpack.c.bf16 %v1521_v33, %v1520_v32 }
 0x129   : > { %v727_v13 = vpop.permute.xlu0 %726 }
 0x12a   : > { %vm731_vm1 = vcmp.eq.s32.totalorder %v722_v12, %v727_v13  ;;  %v776_v18 = vpop.permute.xlu1 %775  ;;  %v872_v13 = vstv %s871_s1 }
 0x12b   : > { %v1514_v15 = vsel %vm731_vm1, 1.0, %v2234_v14  ;;  %vm786_vm3 = vcmp.eq.s32.totalorder %v722_v12, %v776_v18 }
 0x12c   : > { %1516 = vmatmul.msk.f32.vlgmr.msra.gmra.mxu2 %vm737_vm0, %v1514_v15  ;;  %v1518_v26 = vsel %vm786_vm3, 1.0, %v2234_v14 }
 0x131   : > { %v730_v16 = vpop.permute.xlu0 %729 }
 0x132   : > { %vm732_vm2 = vcmp.eq.s32.totalorder %v722_v12, %v730_v16  ;;  %v779_v20 = vpop.permute.xlu1 %778 }
 0x133   : > { %v1515_v17 = vsel %vm732_vm2, 1.0, %v2234_v14  ;;  %vm787_vm4 = vcmp.eq.s32.totalorder %v722_v12, %v779_v20  ;;  %v1682_v20 = vld [vmem:[%s2570_s4 + $0x18] sm:$0xff] }
 0x134   : > { %1517 = vmatmul.msk.f32.gmra.mxu2 %vm737_vm0, %v1515_v17  ;;  %v1519_v27 = vsel %vm787_vm4, 1.0, %v2234_v14  ;;  %1031 = vmatpush.bf16.msra.mxu0 %v1682_v20 }
 0x135   : > { %v798_v30 = vpack.c.bf16 %v1519_v27, %v1518_v26  ;;  %v1853_v27 = vld [vmem:[%s2580_s3] ss:$0 sm:$0xff] }
 0x1af   : > { %v761_v19 = vpop.f32.mrf.mxu2 }
 0x1b0   : > { %v2618_v24 = vadd.f32 %v761_v19, %v718_v21  ;;  %v1681_v21 = vld [vmem:[%s2570_s4 + $0x10] sm:$0xff] }
 0x1b1   : > { %1032 = vmatpush.bf16.msra.mxu0 %v1681_v21 }
 0x1b2   : > { %v873_v14 = vmul.f32 %v872_v13, %v2618_v24 }
 0x1b7   : > { %v764_v23 = vpop.f32.mrf.mxu2 }
 0x1b8   : > { %v2620_v25 = vadd.f32 %v764_v23, %v719_v22  ;;  %v1680_v22 = vld [vmem:[%s2570_s4 + $0x8] sm:$0xff]  ;;  %v1679_v23 = vld [vmem:[%s2570_s4] sm:$0xff] }
 0x1b9   : > { %1033 = vmatpush.bf16.msra.mxu0 %v1680_v22 }
 0x1ba   : > { %v769_v29 = vpack.c.bf16 %v2620_v25, %v2618_v24  ;;  %v874_v15 = vmul.f32 %v872_v13, %v2620_v25 }
 0x1bc   : > { %822 = vmatpush.bf16.msra.mxu1 %v769_v29 }
 0x1bd   : > { %1034 = vmatpush.bf16.msra.mxu0 %v1679_v23 }
 0x1bf   : > { %1522 = vmatmul.msk.bf16.vlgmr.msra.gmra.mxu1 %vm808_vm5, %v798_v30 }
 0x1cf   : > { %1523 = vmatmul.msk.bf16.gmra.mxu1 %vm808_vm5, %v799_v34  ;;  %v1854_v34 = vld [vmem:[%s2580_s3 + $0x1] ss:$0 sm:$0xff] }
 0x23c   : > { %v824_v35 = vpop.f32.mrf.mxu1 }
 0x23d   : > { %v825_v58 = vadd.f32 %v1705_v51, %v824_v35 }
 0x23f   : > { %v834_v63 = vmax.f32 %v825_v58, 0.0 }
 0x244   : > { %v826_v39 = vpop.f32.mrf.mxu1 }
 0x245   : > { %v827_v56 = vadd.f32 %v1706_v49, %v826_v39 }
 0x247   : > { %v835_v61 = vmax.f32 %v827_v56, 0.0 }
 0x249   : > { %v850_v2 = vpack.c.bf16 %v835_v61, %v834_v63 }
 0x24c   : > { %v829_v44 = vpop.f32.mrf.mxu1 }
 0x24d   : > { %v830_v52 = vadd.f32 %v1709_v46, %v829_v44 }
 0x24f   : > { %v836_v59 = vmax.f32 %v830_v52, 0.0 }
 0x254   : > { %v831_v53 = vpop.f32.mrf.mxu1 }
 0x255   : > { %v832_v57 = vadd.f32 %v1710_v50, %v831_v53 }
 0x257   : > { %v837_v60 = vmax.f32 %v832_v57, 0.0 }
 0x259   : > { %v851_v62 = vpack.c.bf16 %v837_v60, %v836_v59 }
 0x25b   : > { %862 = vmatpush.bf16.msrb.mxu2 %v851_v62 }
 0x25f   : > { %863 = vmatpush.bf16.msrb.mxu2 %v850_v2 }
 0x262   : > { %1526 = vmatmul.msk.bf16.vlgmr.msrb.gmra.mxu2 %vm852_vm11, %v849_v3 }
 0x2e5   : > { %v865_v12 = vpop.f32.mrf.mxu2 }
 0x2e6   : > { %v875_v17 = vadd.f32 %v873_v14, %v865_v12 }
 0x2ed   : > { %v867_v16 = vpop.f32.mrf.mxu2 }
 0x2ee   : > { %v876_v18 = vadd.f32 %v874_v15, %v867_v16 }
 0x2f0   : > { %v879_v19 = vpack.c.bf16 %v876_v18, %v875_v17 }
 0x2f2   : > { %953 = vmatmul.bf16.vlgmr.msra.gmra.mxu3 %v879_v19 }
 0x375   : > { %v954_v26 = vpop.f32.mrf.mxu3 }
 0x376   : > { %v955_v28 = vadd.f32 %v1853_v27, %v954_v26 }
 0x378   : > { %v959_v31 = vmax.f32 %v955_v28, 0.0 }
 0x37d   : > { %v956_v29 = vpop.f32.mrf.mxu3 }
 0x37e   : > { %v957_v30 = vadd.f32 %v1853_v27, %v956_v29 }
 0x380   : > { %v960_v32 = vmax.f32 %v957_v30, 0.0 }
 0x382   : > { %v961_v33 = vpack.c.bf16 %v960_v32, %v959_v31 }
 0x384   : > { %1035 = vmatmul.bf16.vlgmr.msra.gmra.mxu0 %v961_v33 }
 0x401   : > { %v1036_v35 = vpop.f32.mrf.mxu0 }
 0x402   : > { %v2664_v36 = vadd.f32 %v1854_v34, %v1036_v35 }
 0x406   : > { %1049 = sbr.rel (%p1592_p5) target bundleno = 1440 (0x5a0), region = 112 }
 0x409   : > { %v1038_v37 = vpop.f32.mrf.mxu0 }
 0x40a   : > { %v2666_v38 = vadd.f32 %v1854_v34, %v1038_v37 }
 0x40b   : > { %v1050_v39 = vmax.f32 %v2664_v36, 0.0  ;;  %1075 = vmatpush.msra.mxu0 %v2620_v25  ;;  %v1694_v42 = vld [vmem:[%s2572_s28 + $0x38] sm:$0xff]  ;;  %v1693_v45 = vld [vmem:[%s2572_s28 + $0x30] sm:$0xff]  ;;  %v1692_v46 = vld [vmem:[%s2572_s28 + $0x28] sm:$0xff] }
 0x40c   : > { %v1051_v40 = vmax.f32 %v2666_v38, 0.0  ;;  %1147 = vmatpush.bf16.msra.mxu1 %v1694_v42  ;;  %v1691_v47 = vld [vmem:[%s2572_s28 + $0x20] sm:$0xff]  ;;  %v1690_v48 = vld [vmem:[%s2572_s28 + $0x18] sm:$0xff]  ;;  %v1689_v49 = vld [vmem:[%s2572_s28 + $0x10] sm:$0xff] }
 0x40d   : > { %v1052_v43 = vadd.f32 %v1050_v39, %v2618_v24  ;;  %1076 = vmatpush.msra.mxu0 %v2618_v24  ;;  %v1688_v50 = vld [vmem:[%s2572_s28 + $0x8] sm:$0xff]  ;;  %v1687_v51 = vld [vmem:[%s2572_s28] sm:$0xff]  ;;  %v1702_v52 = vld [vmem:[%s2578_s9 + $0x38] sm:$0xff] }
 0x40e   : > { %v1053_v44 = vadd.f32 %v1051_v40, %v2620_v25  ;;  %1593 = vmatmul.msk.f32.vlgmr.msra.gmra.mxu0 %vm808_vm5, %v2636_v41  ;;  %1227 = vmatpush.bf16.msra.mxu2 %v1702_v52  ;;  %v1701_v53 = vld [vmem:[%s2578_s9 + $0x30] sm:$0xff]  ;;  %v1700_v54 = vld [vmem:[%s2578_s9 + $0x28] sm:$0xff]  ;;  %v1699_v55 = vld [vmem:[%s2578_s9 + $0x20] sm:$0xff] }
 0x40f   : > { %1054 = vst [vmem:[#allocation2] sm:$0xff] %v1052_v43  ;;  %v1698_v56 = vld [vmem:[%s2578_s9 + $0x18] sm:$0xff]  ;;  %v1697_v57 = vld [vmem:[%s2578_s9 + $0x10] sm:$0xff]  ;;  %v1696_v61 = vld [vmem:[%s2578_s9 + $0x8] sm:$0xff] }
 0x410   : > { %1055 = vst [vmem:[#allocation2 + $0x8] sm:$0xff] %v1053_v44  ;;  %1148 = vmatpush.bf16.msra.mxu1 %v1693_v45  ;;  %v1695_v62 = vld [vmem:[%s2578_s9] sm:$0xff] }
 0x411   : > { %v1855_v63 = vld [vmem:[%s2580_s3 + $0x2] ss:$0 sm:$0xff]  ;;  %v1856_v5 = vld [vmem:[%s2580_s3 + $0x3] ss:$0 sm:$0xff] }
 0x412   : > { %1228 = vmatpush.bf16.msra.mxu2 %v1701_v53 }
 0x414   : > { %1149 = vmatpush.bf16.msra.mxu1 %v1692_v46 }
 0x416   : > { %1229 = vmatpush.bf16.msra.mxu2 %v1700_v54 }
 0x418   : > { %1150 = vmatpush.bf16.msra.mxu1 %v1691_v47 }
 0x41a   : > { %1230 = vmatpush.bf16.msra.mxu2 %v1699_v55 }
 0x41c   : > { %1151 = vmatpush.bf16.msra.mxu1 %v1690_v48 }
 0x41e   : > { %1231 = vmatpush.bf16.msra.mxu2 %v1698_v56 }
 0x420   : > { %1152 = vmatpush.bf16.msra.mxu1 %v1689_v49 }
 0x422   : > { %1232 = vmatpush.bf16.msra.mxu2 %v1697_v57 }
 0x424   : > { %1153 = vmatpush.bf16.msra.mxu1 %v1688_v50 }
 0x426   : > { %1233 = vmatpush.bf16.msra.mxu2 %v1696_v61 }
 0x428   : > { %1154 = vmatpush.bf16.msra.mxu1 %v1687_v51 }
 0x42a   : > { %1234 = vmatpush.bf16.msra.mxu2 %v1695_v62 }
 0x48b   : > { %v1078_v58 = vpop.f32.mrf.mxu0 }
 0x48c   : > { %v1079_v59 = vadd.f32 %v1078_v58, %v2601_v6 }
 0x48e   : > { %v1081_v60 = vpack.c.bf16 %v1079_v59, %v1079_v59 }
 0x490   : > { %1155 = vmatmul.bf16.vlgmr.msra.gmra.mxu1 %v1081_v60 }
 0x50d   : > { %v1156_v0 = vpop.f32.mrf.mxu1 }
 0x50e   : > { %v1157_v1 = vadd.f32 %v1855_v63, %v1156_v0 }
 0x510   : > { %v1160_v2 = vmax.f32 %v1157_v1, 0.0 }
 0x512   : > { %v1161_v3 = vpack.c.bf16 %v1160_v2, %v1160_v2 }
 0x514   : > { %1235 = vmatmul.bf16.vlgmr.msra.gmra.mxu2 %v1161_v3 }
 0x515   : > { %v1158_v4 = vpop.f32.mrf.mxu1 }
 0x597   : > { %v1236_v7 = vpop.f32.mrf.mxu2 }
 0x598   : > { %v1237_v8 = vadd.f32 %v1856_v5, %v1236_v7 }
 0x59a   : > { %v1240_v9 = vmax.f32 %v1237_v8, 0.0 }
 0x59c   : > { %1241 = vst [vmem:[#allocation3] sm:$0xff] %v1240_v9 }
 0x59f   : > { %v1238_v10 = vpop.f32.mrf.mxu2 }
 0x5a0 PF: > { %p1658_p13 = scmp.ne.s32.totalorder %s2346_s20, 2 }
 0x5a2   : > { %1245 = sbr.rel (%p1658_p13) target bundleno = 1579 (0x62b), region = 116 }
 0x5a7   : > { %v1247_v6 = vadd.f32 %v2666_v38, %v2620_v25  ;;  %v1246_v11 = vadd.f32 %v2664_v36, %v2618_v24 }
 0x5a9   : > { %1249 = vst [vmem:[#allocation16 + $0x8] sm:$0xff] %v1247_v6  ;;  %1267 = vmatpush.msra.mxu0 %v1247_v6 }
 0x5aa   : > { %1248 = vst [vmem:[#allocation16] sm:$0xff] %v1246_v11 }
 0x5ab   : > { %1268 = vmatpush.msra.mxu0 %v1246_v11 }
 0x5ac   : > { %1659 = vmatmul.msk.f32.vlgmr.msra.gmra.mxu0 %vm808_vm5, %v2636_v41 }
 0x629   : > { %v1270_v12 = vpop.f32.mrf.mxu0 }
 0x62a   : > { %1273 = vst [vmem:[#allocation17] sm:$0xff] %v1270_v12 }
 0x62b PF: > { %p1775_p10 = scmp.eq.s32.totalorder %s2346_s20, 2  ;;  %s2235_s21 = smov [#allocation16]  }
 0x62c   : > { %s1279_s4 = sshll.u32 %s2235_s21, 4  ;;  %s2821_s3 = sld [smem:[#allocation40_spill]]  ;;  %s1280_s4 = int_to_ptr.vmem [resolvable:$true] %s1279_s4 }
 0x62d   : > { %s2236_s8 = smov 128   ;;  %s2237_s25 = smov 8  }
 0x62e   : > { %s2822_s16 = sld [smem:[#allocation41_spill]]  ;;  %s2238_s5 = smov [#allocation17]  }
 0x62f   : > { %s1294_s23 = sshll.u32 %s2238_s5, 4  ;;  %s1295_s23 = int_to_ptr.vmem [resolvable:$true] %s1294_s23 }
 0x632   : > { %s1281_s6 = sshll.u32 %s2821_s3, 4  ;;  %s1282_s6 = int_to_ptr.hbm [resolvable:$true] %s1281_s6 }
 0x633   : > { %1735 = dma.vmem_to_hbm [thread:$0]  (%p1775_p10), %s1280_s4, 256, %s1282_s6, [#allocation6], %s2236_s8, %s2236_s8, %s2237_s25  }
 0x634   : > { %s1296_s19 = sshll.u32 %s2822_s16, 4  ;;  %s1297_s19 = int_to_ptr.hbm [resolvable:$true] %s1296_s19 }
 0x635   : > { %1737 = dma.vmem_to_hbm [thread:$0]  (%p1775_p10), %s1295_s23, 128, %s1297_s19, [#allocation18]  }
 0x636   : > { %2191 = dma.done.wait (%p1775_p10), [#allocation6], 256  }
 0x637   : > { %2193 = vsyncadd (%p1775_p10), [#allocation6], 4294967040 }
 0x638   : > { %2195 = dma.done.wait (%p1775_p10), [#allocation18], 128  }
 0x639   : > { %2197 = vsyncadd (%p1775_p10), [#allocation18], 4294967168 }
 0x63a PF: > { %s2823_s19 = sld [smem:[#allocation29_spill]]  ;;  %s2826_s29 = smov %s2204_s30 }
 0x63b   : > { %s2824_s24 = sld [smem:[#allocation31_spill]]  ;;  %s2827_s30 = smov %s2208_s15 }
 0x63c   : > { %s2825_s14 = sld [smem:[#allocation30_spill]]  ;;  %s2829_s16 = smov %s2216_s17 }
 0x63d   : > { %s2830_s17 = smov %s2220_s18 }
 0x640   : > { %p27_p3 = scmp.ge.s32.totalorder %s2823_s19, 5  }
 0x641   : > { %s2828_s15 = smov %s2824_s24 }
 0x642   : > { %s2831_s18 = smov %s2825_s14  ;;  %29 = sbr.rel (!%p27_p3) target bundleno = 19 (0x13), region = 188 }
 0x647   :  { %1315 = vsyncpa [#allocation5], 1 }
 0x648   :  { %1317 = vsyncpa [#allocation5 + $0x1], 1 }
 0x649   :  { %1318 = vsyncpa [#allocation10], 1 }
 0x64a   :  { %1319 = vsyncpa [#allocation6], 1 }
 0x64b   :  { %1321 = vsyncpa [#allocation6 + $0x1], 1 }
 0x64c   :  { %1322 = vsyncpa [#allocation18], 1 }
 0x64d   :  { %1323 = vsyncpa [#allocation7], 1 }
 0x64e   :  { %1325 = vsyncpa [#allocation7 + $0x1], 1 }

// kernel: tpu_custom_call.1
= control target key start
LH: loop header
LB: loop body
LE: loop exit
PB: predicated region body
PF: predicated region fallthrough
CT: control target
= control target key end

     0   :  { %s2744_s0 = inlined_call_operand.vmem [shape: f32[3], index: 0, kind: input, shape index: {}]   ;;  %s2745_s1 = inlined_call_operand.hbm [shape: f32[16,128], index: 1, kind: input, shape index: {}]   ;;  %s2746_s2 = inlined_call_operand.hbm [shape: f32[8,128], index: 2, kind: input, shape index: {}]   ;;  %s2747_s3 = inlined_call_operand.vmem [shape: s32[32,1], index: 3, kind: input, shape index: {}]   ;;  %s2748_s4 = inlined_call_operand.vmem [shape: s32[1,32], index: 4, kind: input, shape index: {}]   ;;  %s2749_s5 = inlined_call_operand.vmem [shape: s32[16,1], index: 5, kind: input, shape index: {}]   ;;  %s2750_s6 = inlined_call_operand.vmem [shape: s32[1,16], index: 6, kind: input, shape index: {}]   ;;  %s2751_s7 = inlined_call_operand.vmem [shape: bf16[3,32,128], index: 7, kind: input, shape index: {}]   ;;  %s2752_s8 = inlined_call_operand.hbm [shape: bf16[3,128,128], index: 8, kind: input, shape index: {}]   ;;  %s2753_s9 = inlined_call_operand.hbm [shape: bf16[3,128,128], index: 9, kind: input, shape index: {}]   ;;  %s2754_s10 = inlined_call_operand.hbm [shape: bf16[2,128,128], index: 10, kind: input, shape index: {}]   ;;  %s2755_s11 = inlined_call_operand.hbm [shape: bf16[2,128,128], index: 11, kind: input, shape index: {}]   ;;  %s2756_s12 = inlined_call_operand.hbm [shape: f32[3,8,128], index: 12, kind: input, shape index: {}]   ;;  %s2757_s13 = inlined_call_operand.hbm [shape: f32[16,128], index: 13, kind: output, shape index: {0}]   ;;  %s2758_s14 = inlined_call_operand.hbm [shape: f32[8,128], index: 14, kind: output, shape index: {1}]  }
   0x1   :  { %2776 = sst [smem:[#allocation32_spill]] %s2745_s1 }
   0x2   :  { %2777 = sst [smem:[#allocation33_spill]] %s2747_s3 }
   0x3   :  { %2778 = sst [smem:[#allocation34_spill]] %s2748_s4 }
   0x4   :  { %2779 = sst [smem:[#allocation35_spill]] %s2749_s5 }
   0x5   :  { %2780 = sst [smem:[#allocation36_spill]] %s2750_s6 }
   0x6   :  { %2781 = sst [smem:[#allocation37_spill]] %s2751_s7 }
   0x7   :  { %2782 = sst [smem:[#allocation38_spill]] %s2752_s8 }
   0x8   :  { %2783 = sst [smem:[#allocation39_spill]] %s2753_s9 }
   0x9   :  { %2784 = sst [smem:[#allocation40_spill]] %s2757_s13 }
   0xa   :  { %2785 = sst [smem:[#allocation41_spill]] %s2758_s14 }
   0xb   :  { %20 = vsyncpa [#allocation7], 0 }
   0xc   :  { %21 = vsyncpa [#allocation5], 0 }
   0xd   :  { %22 = vsyncpa [#allocation10], 0 }
   0xe   :  { %23 = vsyncpa [#allocation6], 0 }
   0xf   :  { %24 = vsyncpa [#allocation18], 0  ;;  %s2314_s29 = smov 0   ;;  %s2316_s30 = smov 0  }
  0x10   :  { %s2318_s15 = smov 0   ;;  %s2320_s16 = smov 0  }
  0x11   :  { %s2322_s17 = smov 0   ;;  %s2324_s18 = smov 0  }
  0x12   :  { %s2326_s19 = smov 0  }
  0x13 LB: > { %s2346_s20 = sadd.s32 4294967295, %s2224_s19   ;;  %p223_p0 = scmp.ne.s32.totalorder %s2216_s17, %s2212_s16  ;;  %s2224_s19 = sphi %s2326_s19, %s2823_s19   ;;  %s2220_s18 = sphi %s2324_s18, %s2831_s18   ;;  %s2216_s17 = sphi %s2322_s17, %s2830_s17   ;;  %s2212_s16 = sphi %s2320_s16, %s2829_s16   ;;  %s2208_s15 = sphi %s2318_s15, %s2828_s15   ;;  %s2204_s30 = sphi %s2316_s30, %s2827_s30   ;;  %s2200_s29 = sphi %s2314_s29, %s2826_s29  }
  0x14   : > { %p2763_p1 = scmp.eq.s32.totalorder %s2346_s20, 0  ;;  %p279_p2 = scmp.ne.s32.totalorder %s2204_s30, %s2200_s29 }
  0x15   : > { %p1483_p3 = scmp.ge.s32.totalorder %s2224_s19, 1  ;;  %p388_p4 = scmp.lt.s32.totalorder %s2224_s19, 4 }
  0x16   : > { %p2355_p5 = por %p2763_p1, %p223_p0  ;;  %p2361_p6 = por %p279_p2, %p2763_p1 }
  0x17   : > { %p2365_p7 = pnand %p1483_p3, %p388_p4  ;;  %s2791_s1 = sld [smem:[#allocation32_spill]] }
  0x18   : > { %s2786_s21 = scalar_select %p2355_p5, 1, 0 }
  0x19   : > { %s2788_s22 = scalar_select %p2361_p6, 1, 0 }
  0x1a   : > { %2787 = sst [smem:[#allocation27_spill]] %s2786_s21  ;;  %p1742_p9 = pneg %p2365_p7 }
  0x1b   : > { %2789 = sst [smem:[#allocation28_spill]] %s2788_s22  ;;  %s2226_s27 = smov [#allocation8]  }
  0x1c   : > { %s411_s28 = sshll.u32 %s2226_s27, 4  ;;  %p2377_p10 = pnand %p1742_p9, %p2763_p1  ;;  %s412_s28 = int_to_ptr.vmem [resolvable:$true] %s411_s28 }
  0x1d   : > { %s409_s26 = sshll.u32 %s2791_s1, 4  ;;  %s2227_s16 = smov 128   ;;  %s410_s26 = int_to_ptr.hbm [resolvable:$true] %s409_s26 }
  0x1e   : > { %s2228_s24 = smov 8   ;;  %p218_p11 = scmp.eq.s32.totalorder %s2224_s19, 0 }
  0x1f   : > { %1748 = dma.hbm_to_vmem [thread:$0]  (!%p2377_p10), %s410_s26, 256, %s412_s28, [#allocation5], %s2227_s16, %s2227_s16, %s2228_s24  }
  0x20   : > { %p217_p12 = scmp.ne.s32.totalorder %s2220_s18, %s2216_s17  ;;  %p2764_p13 = scmp.lt.s32.totalorder %s2224_s19, 3 }
  0x21   : > { %s457_s1 = sand.u32 1, %s2224_s19   ;;  %s2760_s27 = sand.u32 1, %s2220_s18  }
  0x22   : > { %p219_p0 = por %p218_p11, %p217_p12  ;;  %s2762_s14 = sshll.u32 %s2224_s19, 6 }
  0x23   : > { %s2395_s13 = sshll.u32 %s2760_s27, 6  ;;  %s2793_s8 = sld [smem:[#allocation38_spill]] }
  0x24   : > { %s461_s28 = scalar_lea.vmem [#allocation11], %s2395_s13  ;;  %p2405_p2 = pnand %p2764_p13, %p219_p0 }
  0x25   : > { %s469_s16 = sshll.u32 %s461_s28, 4  ;;  %s2409_s27 = scalar_lea.sflag [#allocation5], %s457_s1  ;;  %s470_s16 = int_to_ptr.vmem [resolvable:$true] %s469_s16 }
  0x26   : > { %p2775_p4 = pneg %p2405_p2 }
  0x29   : > { %s466_s3 = scalar_lea.hbm %s2793_s8, %s2762_s14  ;;  %s1894_s6 = scalar_lea.hbm %s2793_s8, 192 }
  0x2a   : > { %s467_s26 = sshll.u32 %s466_s3, 4  ;;  %s468_s26 = int_to_ptr.hbm [resolvable:$true] %s467_s26 }
  0x2b   : > { %s1887_s25 = sshra.s32 %s468_s26, 4  ;;  %s1888_s25 = int_to_ptr.hbm [resolvable:$true] %s1887_s25 }
  0x2c   : > { %s1889_s5 = scalar_lea.hbm %s1888_s25, 64  ;;  %p1895_p0 = scmp.lt.s32.totalorder %s1888_s25, %s2793_s8 }
  0x2d   : > { %p1890_p3 = scmp.ne.s32.totalorder %s1888_s25, %s1889_s5  ;;  %p1896_p8 = scmp.lt.s32.totalorder %s1894_s6, %s1889_s5 }
  0x2f   : > { %p1892_p9 = pnand %p2775_p4, %p1890_p3  ;;  %p1897_p1 = por %p1896_p8, %p1895_p0 }
  0x31   : > { %p1893_p12 = pneg %p1892_p9 }
  0x33   : > { %p1898_p13 = pnand %p1897_p1, %p1893_p12 }
  0x35   : > { %1901 = shalt.err (!%p1898_p13)
}
  0x36   : > { %s2769_s1 = smov 64   ;;  %s2771_s7 = smov 4  }
  0x37   : > { %1755 = dma.hbm_to_vmem [thread:$0]  (!%p2405_p2), %s468_s26, 1024, %s470_s16, %s2409_s27, %s2769_s1, %s2769_s1, %s2771_s7  }
  0x38   : > { %s2795_s3 = sshll.u32 %s2224_s19, 6  ;;  %s2796_s9 = sld [smem:[#allocation39_spill]] }
  0x39   : > { %s483_s25 = scalar_lea.vmem [#allocation12], %s2395_s13 }
  0x3a   : > { %s491_s6 = sshll.u32 %s483_s25, 4  ;;  %s492_s6 = int_to_ptr.vmem [resolvable:$true] %s491_s6 }
  0x3e   : > { %s488_s5 = scalar_lea.hbm %s2796_s9, %s2795_s3  ;;  %s1924_s16 = scalar_lea.hbm %s2796_s9, 192 }
  0x3f   : > { %s489_s28 = sshll.u32 %s488_s5, 4  ;;  %s490_s28 = int_to_ptr.hbm [resolvable:$true] %s489_s28 }
  0x40   : > { %s1917_s8 = sshra.s32 %s490_s28, 4  ;;  %s1918_s8 = int_to_ptr.hbm [resolvable:$true] %s1917_s8 }
  0x41   : > { %s1919_s22 = scalar_lea.hbm %s1918_s8, 64  ;;  %p1925_p3 = scmp.lt.s32.totalorder %s1918_s8, %s2796_s9 }
  0x42   : > { %p1920_p1 = scmp.ne.s32.totalorder %s1918_s8, %s1919_s22  ;;  %p1926_p9 = scmp.lt.s32.totalorder %s1924_s16, %s1919_s22 }
  0x44   : > { %p1922_p8 = pnand %p1920_p1, %p2775_p4  ;;  %p1927_p12 = por %p1926_p9, %p1925_p3 }
  0x46   : > { %p1923_p13 = pneg %p1922_p8 }
  0x48   : > { %p1928_p0 = pnand %p1927_p12, %p1923_p13 }
  0x4a   : > { %1931 = shalt.err (!%p1928_p0)
}
  0x4b   : > { %s2797_s13 = smov 64   ;;  %s2450_s8 = sadd.s32 1, %s2224_s19  }
  0x4c   : > { %1758 = dma.hbm_to_vmem [thread:$0]  (!%p2405_p2), %s490_s28, 1024, %s492_s6, %s2409_s27, %s2797_s13, %s2797_s13, %s2771_s7  }
  0x4d   : > { %2798 = sst [smem:[#allocation29_spill]] %s2450_s8  ;;  %s207_s21 = ssub.s32 %s2224_s19, %s2450_s8 }
  0x4e   : > { %p259_p1 = scmp.lt.s32.totalorder %s2224_s19, 1  ;;  %p208_p8 = scmp.eq.s32.totalorder %s207_s21, 0 }
  0x4f   : > { %p261_p13 = scmp.lt.s32.totalorder %s2450_s8, 1  ;;  %s2799_s1 = sadd.s32 1, %s2220_s18 }
  0x50   : > { %s260_s22 = scalar_select %p259_p1, %s2224_s19, 1 }
  0x51   : > { %s2460_s3 = scalar_select %p208_p8, %s2220_s18, %s2799_s1  }
  0x52   : > { %s262_s14 = scalar_select %p261_p13, %s2450_s8, 1 }
  0x53   : > { %2800 = sst [smem:[#allocation30_spill]] %s2460_s3  ;;  %s266_s5 = sadd.s32 1, %s2208_s15 }
  0x54   : > { %p273_p3 = scmp.ne.s32.totalorder %s2208_s15, %s2204_s30  ;;  %s263_s25 = ssub.s32 %s260_s22, %s262_s14 }
  0x55   : > { %s503_s6 = sand.u32 1, %s2208_s15   ;;  %p264_p9 = scmp.eq.s32.totalorder %s263_s25, 0 }
  0x56   : > { %p275_p12 = por %p273_p3, %p218_p11  ;;  %s1494_s28 = sshll.u32 %s503_s6, 6 }
  0x57   : > { %s1668_s26 = sshll.u32 %s260_s22, 6  ;;  %s505_s1 = scalar_lea.vmem [#allocation13], %s1494_s28 }
  0x58   : > { %s2470_s16 = scalar_select %p264_p9, %s2208_s15, %s266_s5  }
  0x59   : > { %s512_s7 = scalar_lea.hbm %s2754_s10, %s1668_s26  ;;  %s515_s3 = sshll.u32 %s505_s1, 4  ;;  %s516_s3 = int_to_ptr.vmem [resolvable:$true] %s515_s3 }
  0x5a   : > { %2801 = sst [smem:[#allocation31_spill]] %s2470_s16  ;;  %s513_s9 = sshll.u32 %s512_s7, 4  ;;  %s514_s9 = int_to_ptr.hbm [resolvable:$true] %s513_s9 }
  0x5b   : > { %p2802_p0 = scmp.lt.s32.totalorder %s2224_s19, 3  ;;  %s536_s22 = scalar_lea.hbm %s2755_s11, %s1668_s26 }
  0x5c   : > { %s529_s5 = scalar_lea.vmem [#allocation14], %s1494_s28  ;;  %s537_s4 = sshll.u32 %s536_s22, 4  ;;  %s538_s4 = int_to_ptr.hbm [resolvable:$true] %s537_s4 }
  0x5d   : > { %p2477_p1 = pnand %p2802_p0, %p275_p12  ;;  %s2484_s6 = sshll.u32 %s529_s5, 4  ;;  %s540_s6 = int_to_ptr.vmem [resolvable:$true] %s2484_s6 }
  0x5e   : > { %s1947_s7 = sshra.s32 %s514_s9, 4  ;;  %s1954_s8 = scalar_lea.hbm %s2754_s10, 128  ;;  %s1948_s7 = int_to_ptr.hbm [resolvable:$true] %s1947_s7 }
  0x5f   : > { %s1949_s21 = scalar_lea.hbm %s1948_s7, 64  ;;  %p1951_p8 = pneg %p2477_p1 }
  0x60   : > { %p1950_p11 = scmp.ne.s32.totalorder %s1948_s7, %s1949_s21  ;;  %p1955_p9 = scmp.lt.s32.totalorder %s1948_s7, %s2754_s10 }
  0x61   : > { %p1956_p12 = scmp.lt.s32.totalorder %s1954_s8, %s1949_s21 }
  0x62   : > { %p1952_p13 = pnand %p1951_p8, %p1950_p11 }
  0x63   : > { %p1957_p0 = por %p1956_p12, %p1955_p9 }
  0x64   : > { %p1953_p3 = pneg %p1952_p13 }
  0x66   : > { %p1958_p4 = pnand %p1957_p0, %p1953_p3 }
  0x68   : > { %1961 = shalt.err (!%p1958_p4)
}
  0x69   : > { %s2804_s28 = smov 4   ;;  %s1977_s16 = sshra.s32 %s538_s4, 4  ;;  %s1978_s16 = int_to_ptr.hbm [resolvable:$true] %s1977_s16 }
  0x6a   : > { %1761 = dma.hbm_to_vmem [thread:$0]  (!%p2477_p1), %s514_s9, 1024, %s516_s3, %s2409_s27, %s2797_s13, %s2797_s13, %s2804_s28  }
  0x6b   : > { %s1979_s22 = scalar_lea.hbm %s1978_s16, 64  ;;  %s1984_s21 = scalar_lea.hbm %s2755_s11, 128 }
  0x6c   : > { %p1980_p11 = scmp.ne.s32.totalorder %s1978_s16, %s1979_s22  ;;  %p1985_p4 = scmp.lt.s32.totalorder %s1978_s16, %s2755_s11 }
  0x6d   : > { %p1986_p9 = scmp.lt.s32.totalorder %s1984_s21, %s1979_s22 }
  0x6e   : > { %p1982_p13 = pnand %p1980_p11, %p1951_p8 }
  0x6f   : > { %p1987_p12 = por %p1986_p9, %p1985_p4 }
  0x70   : > { %p1983_p3 = pneg %p1982_p13 }
  0x72   : > { %p1988_p0 = pnand %p1987_p12, %p1983_p3 }
  0x74   : > { %1991 = shalt.err (!%p1988_p0)
}
  0x75   : > { %1764 = dma.hbm_to_vmem [thread:$0]  (!%p2477_p1), %s538_s4, 1024, %s540_s6, %s2409_s27, %s2797_s13, %s2797_s13, %s2804_s28  }
  0x76   : > { %s400_s25 = sshll.u32 %s2744_s0, 4  ;;  %s424_s22 = sshll.u32 %s2746_s2, 4  ;;  %s401_s25 = int_to_ptr.vmem [resolvable:$true] %s400_s25  ;;  %s425_s22 = int_to_ptr.hbm [resolvable:$true] %s424_s22 }
  0x77   : > { %s2231_s5 = smov [#allocation4]   ;;  %s2232_s14 = smov [#allocation9]  }
  0x78   : > { %1745 = dma.vmem_to_smem (!%p2377_p10), %s401_s25, 16, %s2231_s5, [#allocation7]  }
  0x79   : > { %s426_s7 = sshll.u32 %s2232_s14, 4  ;;  %s2805_s21 = sand.u32 1, %s2220_s18   ;;  %s427_s7 = int_to_ptr.vmem [resolvable:$true] %s426_s7 }
  0x7a   : > { %s1500_s1 = sshll.u32 %s2805_s21, 3  ;;  %s1501_s13 = sshll.u32 %s2224_s19, 3 }
  0x7b   : > { %1751 = dma.hbm_to_vmem [thread:$0]  (!%p2377_p10), %s425_s22, 128, %s427_s7, [#allocation10]  }
  0x7c   : > { %s553_s6 = scalar_lea.vmem [#allocation15], %s1500_s1  ;;  %s557_s9 = scalar_lea.hbm %s2756_s12, %s1501_s13 }
  0x7d   : > { %s561_s4 = sshll.u32 %s553_s6, 4  ;;  %s559_s3 = sshll.u32 %s557_s9, 4  ;;  %s562_s4 = int_to_ptr.vmem [resolvable:$true] %s561_s4  ;;  %s560_s3 = int_to_ptr.hbm [resolvable:$true] %s559_s3 }
  0x7e   : > { %s2052_s25 = sshra.s32 %s560_s3, 4  ;;  %p2806_p8 = pneg %p2405_p2  ;;  %s2053_s25 = int_to_ptr.hbm [resolvable:$true] %s2052_s25 }
  0x7f   : > { %s2054_s26 = scalar_lea.hbm %s2053_s25, 8  ;;  %s2059_s19 = scalar_lea.hbm %s2756_s12, 24 }
  0x80   : > { %p2055_p1 = scmp.ne.s32.totalorder %s2053_s25, %s2054_s26  ;;  %p2060_p10 = scmp.lt.s32.totalorder %s2053_s25, %s2756_s12 }
  0x81   : > { %p2061_p3 = scmp.lt.s32.totalorder %s2059_s19, %s2054_s26 }
  0x82   : > { %p2057_p11 = pnand %p2055_p1, %p2806_p8 }
  0x83   : > { %p2062_p4 = por %p2061_p3, %p2060_p10 }
  0x84   : > { %p2058_p13 = pneg %p2057_p11 }
  0x86   : > { %p2063_p9 = pnand %p2062_p4, %p2058_p13 }
  0x88   : > { %2066 = shalt.err (!%p2063_p9)
}
  0x89   : > { %1767 = dma.hbm_to_vmem [thread:$0]  (!%p2405_p2), %s560_s3, 128, %s562_s4, %s2409_s27  }
  0x8a   : > { %570 = sbr.rel (%p2365_p7) target bundleno = 1594 (0x63a), region = 72  ;;  %p2807_p12 = scmp.eq.s32.totalorder (!%p2365_p7), %s2346_s20, 0 }
  0x8f   : > { %2167 = dma.done.wait (%p2807_p12), [#allocation7], 16   ;;  %p2808_p0 = pmov %p2807_p12 }
  0x91   : > { %2169 = vsyncadd (%p2808_p0), [#allocation7], 4294967280  ;;  %p2809_p1 = pmov %p2808_p0 }
  0x92   : > { %p2810_p8 = pmov %p2808_p0 }
  0x93   : > { %2171 = dma.done.wait (%p2809_p1), [#allocation5], 256  }
  0x94   : > { %2173 = vsyncadd (%p2810_p8), [#allocation5], 4294967040  ;;  %p2811_p11 = pmov %p2808_p0 }
  0x95   : > { %p2812_p2 = pmov %p2808_p0 }
  0x96   : > { %2175 = dma.done.wait (%p2811_p11), [#allocation10], 128  }
  0x97   : > { %2177 = vsyncadd (%p2812_p2), [#allocation10], 4294967168  ;;  %s587_s27 = sand.u32 1, %s2346_s20   ;;  %s589_s24 = sand.u32 1, %s2216_s17  }
  0x98   : > { %s1506_s14 = sshll.u32 %s589_s24, 6  ;;  %s588_s7 = scalar_lea.sflag [#allocation5], %s587_s27 }
  0x99   : > { %s2563_s21 = scalar_lea.vmem [#allocation11], %s1506_s14 }
  0x9a   : > { %2179 = dma.done.wait (%p2355_p5), %s588_s7, 2048  }
  0x9b   : > { %2181 = vsyncadd (%p2355_p5), %s588_s7, 4294965248  ;;  %s609_s13 = sand.u32 1, %s2204_s30   ;;  %s2570_s4 = scalar_lea.vmem [#allocation12], %s1506_s14 }
  0x9c   : > { %s1508_s6 = sshll.u32 %s609_s13, 6 }
  0x9d   : > { %s2572_s28 = scalar_lea.vmem [#allocation13], %s1508_s6 }
  0x9e   : > { %2183 = dma.done.wait (%p2361_p6), %s588_s7, 2048  }
  0x9f   : > { %2185 = vsyncadd (%p2361_p6), %s588_s7, 4294965248  ;;  %s1510_s8 = sshll.u32 %s589_s24, 3  ;;  %s2578_s9 = scalar_lea.vmem [#allocation14], %s1508_s6 }
  0xa0   : > { %s2580_s3 = scalar_lea.vmem [#allocation15], %s1510_s8 }
  0xa1   : > { %2187 = dma.done.wait (%p2355_p5), %s588_s7, 128  }
  0xa2   : > { %2189 = vsyncadd (%p2355_p5), %s588_s7, 4294967168 }
  0xa3   : > { %637 = sfence }
  0xa4   : > { %p698_p7 = scmp.lt.s32.totalorder %s2346_s20, 2  ;;  %s2815_s19 = sld [smem:[#allocation37_spill]] }
  0xa5   : > { %p2816_p6 = scmp.ne.s32.totalorder %s2346_s20, 0 }
  0xa6   : > { %s699_s25 = scalar_select %p698_p7, %s2346_s20, 2 }
  0xa7   : > { %711 = sbr.rel (%p2816_p6) target bundleno = 176 (0xb0), region = 108 }
  0xa8   : > { %s1670_s26 = sshll.u32 %s699_s25, 4 }
  0xaa   : > { %s2591_s22 = scalar_lea.vmem %s2815_s19, %s1670_s26 }
  0xac   : > { %v712_v0 = vld [vmem:[#allocation8] sm:$0xff]  ;;  %v713_v1 = vld [vmem:[#allocation8 + $0x8] sm:$0xff]  ;;  %v716_v2 = vld [vmem:[#allocation9] sm:$0xff] }
  0xad   : > { %714 = vst [vmem:[#allocation2] sm:$0xff] %v712_v0 }
  0xae   : > { %715 = vst [vmem:[#allocation2 + $0x8] sm:$0xff] %v713_v1 }
  0xaf   : > { %717 = vst [vmem:[#allocation3] sm:$0xff] %v716_v2 }
  0xb0 PF: > { %s2817_s27 = sld [smem:[#allocation35_spill]]  ;;  %v2233_v4 = vmov 0   ;;  %v721_v11 = vlaneseq  ;;  %vm737_vm0 = vcmask 64512   ;;  %v2234_v14 = vmov 0.0   ;;  %v1678_v38 = vld [vmem:[%s2563_s21 + $0x38] sm:$0xff]  ;;  %v1677_v40 = vld [vmem:[%s2563_s21 + $0x30] sm:$0xff] }
  0xb1   : > { %1848 = vset.pattern.permute.xlu0 %v2233_v4  ;;  %1849 = vset.pattern.permute.xlu1 %v2233_v4  ;;  %s2818_s13 = sld [smem:[#allocation33_spill]]  ;;  %vm808_vm5 = vcmask 130048   ;;  %v1676_v42 = vld [vmem:[%s2563_s21 + $0x28] sm:$0xff]  ;;  %v1711_v43 = vld [vmem:[%s2591_s22 + $0x8] sm:$0xff]   ;;  %v1675_v45 = vld [vmem:[%s2563_s21 + $0x20] sm:$0xff]  ;;  %vm852_vm11 = vcmask 261120  }
  0xb2   : > { %1850 = vset.pattern.permute.xlu2 %v2233_v4  ;;  %v722_v12 = vand.u32 127, %v721_v11  ;;  %v839_v36 = vshrl.u32 %v721_v11, 7  ;;  %s2819_s23 = sld [smem:[#allocation36_spill]]  ;;  %945 = vmatpush.bf16.msra.mxu3 %v1678_v38  ;;  %v1709_v46 = vunpack.c.l.bf16 %v1711_v43  ;;  %v1704_v47 = vld [vmem:[%s2591_s22] sm:$0xff]   ;;  %v1674_v48 = vld [vmem:[%s2563_s21 + $0x18] sm:$0xff]  ;;  %v1710_v50 = vunpack.c.h.bf16 %v1711_v43  ;;  %v1683_v11 = vld [vmem:[%s2570_s4 + $0x20] sm:$0xff] }
  0xb3   : > { %v1706_v49 = vunpack.c.h.bf16 %v1704_v47  ;;  %v1705_v51 = vunpack.c.l.bf16 %v1704_v47  ;;  %s2820_s7 = sld [smem:[#allocation34_spill]]  ;;  %v1673_v4 = vld [vmem:[%s2563_s21 + $0x10] sm:$0xff]  ;;  %p1592_p5 = scmp.ge.s32.totalorder %s2346_s20, 2 }
  0xb4   : > { %v718_v21 = vld [vmem:[#allocation2] sm:$0xff]  ;;  %v840_v54 = vadd.s32 8, %v839_v36  ;;  %s870_s22 = sld [smem:[#allocation4 + %s2346_s20]] }
  0xb5   : > { %v719_v22 = vld [vmem:[#allocation2 + $0x8] sm:$0xff] }
  0xb6   : > { %v723_v3 = vld [vmem:[%s2817_s27] sm:$0xff]  ;;  %v724_v5 = vld [vmem:[%s2817_s27 + $0x8] sm:$0xff]  ;;  %v2601_v6 = vld [vmem:[#allocation3] sm:$0xff]  ;;  %946 = vmatpush.bf16.msra.mxu3 %v1677_v40 }
  0xb7   : > { %726 = vperm.xlu0 %1848, %v723_v3   ;;  %759 = vmatpush.msra.mxu2 %v2601_v6  ;;  %v770_v7 = vld [vmem:[%s2818_s13] sm:$0xff]  ;;  %v772_v8 = vld [vmem:[%s2818_s13 + $0x10] sm:$0xff]  ;;  %v771_v9 = vld [vmem:[%s2818_s13 + $0x8] sm:$0xff] }
  0xb8   : > { %775 = vperm.xlu1 %1849, %v770_v7   ;;  %781 = vperm.xlu2 %1850, %v772_v8   ;;  %v773_v10 = vld [vmem:[%s2818_s13 + $0x18] sm:$0xff]  ;;  %v1852_v37 = vld [vmem:[%s2819_s23] ss:$0 sm:$0xff]  ;;  %v1671_v7 = vld [vmem:[%s2563_s21] sm:$0xff] }
  0xb9   : > { %vm1043_vm8 = vcmp.eq.s32.totalorder %v839_v36, %v1852_v37  ;;  %v1851_v55 = vld [vmem:[%s2820_s7] ss:$0 sm:$0xff]  ;;  %v1686_v8 = vld [vmem:[%s2570_s4 + $0x38] sm:$0xff] }
  0xba   : > { %v2636_v41 = vsel %vm1043_vm8, 1.0, %v2234_v14  ;;  %947 = vmatpush.bf16.msra.mxu3 %v1676_v42  ;;  %vm843_vm9 = vcmp.eq.s32.totalorder %v839_v36, %v1851_v55  ;;  %vm844_vm10 = vcmp.eq.s32.totalorder %v840_v54, %v1851_v55  ;;  %1027 = vmatpush.bf16.msra.mxu0 %v1686_v8  ;;  %s871_s1 = sadd.f32 1.0, %s870_s22 }
  0xbb   : > { %v1524_v0 = vsel %vm843_vm9, 1.0, %v2234_v14  ;;  %v1525_v1 = vsel %vm844_vm10, 1.0, %v2234_v14 }
  0xbc   : > { %v849_v3 = vpack.c.bf16 %v1525_v1, %v1524_v0 }
  0xbe   : > { %948 = vmatpush.bf16.msra.mxu3 %v1675_v45 }
  0xbf   : > { %729 = vperm.xlu0 %1848, %v724_v5   ;;  %v1672_v5 = vld [vmem:[%s2563_s21 + $0x8] sm:$0xff] }
  0xc0   : > { %778 = vperm.xlu1 %1849, %v771_v9   ;;  %784 = vperm.xlu2 %1850, %v773_v10   ;;  %v1685_v9 = vld [vmem:[%s2570_s4 + $0x30] sm:$0xff]  ;;  %v1684_v10 = vld [vmem:[%s2570_s4 + $0x28] sm:$0xff] }
  0xc1   : > { %1028 = vmatpush.bf16.msra.mxu0 %v1685_v9 }
  0xc2   : > { %949 = vmatpush.bf16.msra.mxu3 %v1674_v48 }
  0xc5   : > { %1029 = vmatpush.bf16.msra.mxu0 %v1684_v10 }
  0xc6   : > { %950 = vmatpush.bf16.msra.mxu3 %v1673_v4 }
  0xc9   : > { %1030 = vmatpush.bf16.msra.mxu0 %v1683_v11 }
  0xca   : > { %951 = vmatpush.bf16.msra.mxu3 %v1672_v5 }
  0xce   : > { %952 = vmatpush.bf16.msra.mxu3 %v1671_v7 }
 0x112   : > { %v782_v28 = vpop.permute.xlu2 %781 }
 0x113   : > { %vm788_vm6 = vcmp.eq.s32.totalorder %v722_v12, %v782_v28 }
 0x114   : > { %v1520_v32 = vsel %vm788_vm6, 1.0, %v2234_v14 }
 0x11a   : > { %v785_v31 = vpop.permute.xlu2 %784 }
 0x11b   : > { %vm789_vm7 = vcmp.eq.s32.totalorder %v722_v12, %v785_v31 }
 0x11c   : > { %v1521_v33 = vsel %vm789_vm7, 1.0, %v2234_v14 }
 0x11d   : > { %v799_v34 = vpack.c.bf16 %v1521_v33, %v1520_v32 }
 0x129   : > { %v727_v13 = vpop.permute.xlu0 %726 }
 0x12a   : > { %vm731_vm1 = vcmp.eq.s32.totalorder %v722_v12, %v727_v13  ;;  %v776_v18 = vpop.permute.xlu1 %775  ;;  %v872_v13 = vstv %s871_s1 }
 0x12b   : > { %v1514_v15 = vsel %vm731_vm1, 1.0, %v2234_v14  ;;  %vm786_vm3 = vcmp.eq.s32.totalorder %v722_v12, %v776_v18 }
 0x12c   : > { %1516 = vmatmul.msk.f32.vlgmr.msra.gmra.mxu2 %vm737_vm0, %v1514_v15  ;;  %v1518_v26 = vsel %vm786_vm3, 1.0, %v2234_v14 }
 0x131   : > { %v730_v16 = vpop.permute.xlu0 %729 }
 0x132   : > { %vm732_vm2 = vcmp.eq.s32.totalorder %v722_v12, %v730_v16  ;;  %v779_v20 = vpop.permute.xlu1 %778 }
 0x133   : > { %v1515_v17 = vsel %vm732_vm2, 1.0, %v2234_v14  ;;  %vm787_vm4 = vcmp.eq.s32.totalorder %v722_v12, %v779_v20  ;;  %v1682_v20 = vld [vmem:[%s2570_s4 + $0x18] sm:$0xff] }
 0x134   : > { %1517 = vmatmul.msk.f32.gmra.mxu2 %vm737_vm0, %v1515_v17  ;;  %v1519_v27 = vsel %vm787_vm4, 1.0, %v2234_v14  ;;  %1031 = vmatpush.bf16.msra.mxu0 %v1682_v20 }
 0x135   : > { %v798_v30 = vpack.c.bf16 %v1519_v27, %v1518_v26  ;;  %v1853_v27 = vld [vmem:[%s2580_s3] ss:$0 sm:$0xff] }
 0x1af   : > { %v761_v19 = vpop.f32.mrf.mxu2 }
 0x1b0   : > { %v2618_v24 = vadd.f32 %v761_v19, %v718_v21  ;;  %v1681_v21 = vld [vmem:[%s2570_s4 + $0x10] sm:$0xff] }
 0x1b1   : > { %1032 = vmatpush.bf16.msra.mxu0 %v1681_v21 }
 0x1b2   : > { %v873_v14 = vmul.f32 %v872_v13, %v2618_v24 }
 0x1b7   : > { %v764_v23 = vpop.f32.mrf.mxu2 }
 0x1b8   : > { %v2620_v25 = vadd.f32 %v764_v23, %v719_v22  ;;  %v1680_v22 = vld [vmem:[%s2570_s4 + $0x8] sm:$0xff]  ;;  %v1679_v23 = vld [vmem:[%s2570_s4] sm:$0xff] }
 0x1b9   : > { %1033 = vmatpush.bf16.msra.mxu0 %v1680_v22 }
 0x1ba   : > { %v769_v29 = vpack.c.bf16 %v2620_v25, %v2618_v24  ;;  %v874_v15 = vmul.f32 %v872_v13, %v2620_v25 }
 0x1bc   : > { %822 = vmatpush.bf16.msra.mxu1 %v769_v29 }
 0x1bd   : > { %1034 = vmatpush.bf16.msra.mxu0 %v1679_v23 }
 0x1bf   : > { %1522 = vmatmul.msk.bf16.vlgmr.msra.gmra.mxu1 %vm808_vm5, %v798_v30 }
 0x1cf   : > { %1523 = vmatmul.msk.bf16.gmra.mxu1 %vm808_vm5, %v799_v34  ;;  %v1854_v34 = vld [vmem:[%s2580_s3 + $0x1] ss:$0 sm:$0xff] }
 0x23c   : > { %v824_v35 = vpop.f32.mrf.mxu1 }
 0x23d   : > { %v825_v58 = vadd.f32 %v1705_v51, %v824_v35 }
 0x23f   : > { %v834_v63 = vmax.f32 %v825_v58, 0.0 }
 0x244   : > { %v826_v39 = vpop.f32.mrf.mxu1 }
 0x245   : > { %v827_v56 = vadd.f32 %v1706_v49, %v826_v39 }
 0x247   : > { %v835_v61 = vmax.f32 %v827_v56, 0.0 }
 0x249   : > { %v850_v2 = vpack.c.bf16 %v835_v61, %v834_v63 }
 0x24c   : > { %v829_v44 = vpop.f32.mrf.mxu1 }
 0x24d   : > { %v830_v52 = vadd.f32 %v1709_v46, %v829_v44 }
 0x24f   : > { %v836_v59 = vmax.f32 %v830_v52, 0.0 }
 0x254   : > { %v831_v53 = vpop.f32.mrf.mxu1 }
 0x255   : > { %v832_v57 = vadd.f32 %v1710_v50, %v831_v53 }
 0x257   : > { %v837_v60 = vmax.f32 %v832_v57, 0.0 }
 0x259   : > { %v851_v62 = vpack.c.bf16 %v837_v60, %v836_v59 }
 0x25b   : > { %862 = vmatpush.bf16.msrb.mxu2 %v851_v62 }
 0x25f   : > { %863 = vmatpush.bf16.msrb.mxu2 %v850_v2 }
 0x262   : > { %1526 = vmatmul.msk.bf16.vlgmr.msrb.gmra.mxu2 %vm852_vm11, %v849_v3 }
 0x2e5   : > { %v865_v12 = vpop.f32.mrf.mxu2 }
 0x2e6   : > { %v875_v17 = vadd.f32 %v873_v14, %v865_v12 }
 0x2ed   : > { %v867_v16 = vpop.f32.mrf.mxu2 }
 0x2ee   : > { %v876_v18 = vadd.f32 %v874_v15, %v867_v16 }
 0x2f0   : > { %v879_v19 = vpack.c.bf16 %v876_v18, %v875_v17 }
 0x2f2   : > { %953 = vmatmul.bf16.vlgmr.msra.gmra.mxu3 %v879_v19 }
 0x375   : > { %v954_v26 = vpop.f32.mrf.mxu3 }
 0x376   : > { %v955_v28 = vadd.f32 %v1853_v27, %v954_v26 }
 0x378   : > { %v959_v31 = vmax.f32 %v955_v28, 0.0 }
 0x37d   : > { %v956_v29 = vpop.f32.mrf.mxu3 }
 0x37e   : > { %v957_v30 = vadd.f32 %v1853_v27, %v956_v29 }
 0x380   : > { %v960_v32 = vmax.f32 %v957_v30, 0.0 }
 0x382   : > { %v961_v33 = vpack.c.bf16 %v960_v32, %v959_v31 }
 0x384   : > { %1035 = vmatmul.bf16.vlgmr.msra.gmra.mxu0 %v961_v33 }
 0x401   : > { %v1036_v35 = vpop.f32.mrf.mxu0 }
 0x402   : > { %v2664_v36 = vadd.f32 %v1854_v34, %v1036_v35 }
 0x406   : > { %1049 = sbr.rel (%p1592_p5) target bundleno = 1440 (0x5a0), region = 112 }
 0x409   : > { %v1038_v37 = vpop.f32.mrf.mxu0 }
 0x40a   : > { %v2666_v38 = vadd.f32 %v1854_v34, %v1038_v37 }
 0x40b   : > { %v1050_v39 = vmax.f32 %v2664_v36, 0.0  ;;  %1075 = vmatpush.msra.mxu0 %v2620_v25  ;;  %v1694_v42 = vld [vmem:[%s2572_s28 + $0x38] sm:$0xff]  ;;  %v1693_v45 = vld [vmem:[%s2572_s28 + $0x30] sm:$0xff]  ;;  %v1692_v46 = vld [vmem:[%s2572_s28 + $0x28] sm:$0xff] }
 0x40c   : > { %v1051_v40 = vmax.f32 %v2666_v38, 0.0  ;;  %1147 = vmatpush.bf16.msra.mxu1 %v1694_v42  ;;  %v1691_v47 = vld [vmem:[%s2572_s28 + $0x20] sm:$0xff]  ;;  %v1690_v48 = vld [vmem:[%s2572_s28 + $0x18] sm:$0xff]  ;;  %v1689_v49 = vld [vmem:[%s2572_s28 + $0x10] sm:$0xff] }
 0x40d   : > { %v1052_v43 = vadd.f32 %v1050_v39, %v2618_v24  ;;  %1076 = vmatpush.msra.mxu0 %v2618_v24  ;;  %v1688_v50 = vld [vmem:[%s2572_s28 + $0x8] sm:$0xff]  ;;  %v1687_v51 = vld [vmem:[%s2572_s28] sm:$0xff]  ;;  %v1702_v52 = vld [vmem:[%s2578_s9 + $0x38] sm:$0xff] }
 0x40e   : > { %v1053_v44 = vadd.f32 %v1051_v40, %v2620_v25  ;;  %1593 = vmatmul.msk.f32.vlgmr.msra.gmra.mxu0 %vm808_vm5, %v2636_v41  ;;  %1227 = vmatpush.bf16.msra.mxu2 %v1702_v52  ;;  %v1701_v53 = vld [vmem:[%s2578_s9 + $0x30] sm:$0xff]  ;;  %v1700_v54 = vld [vmem:[%s2578_s9 + $0x28] sm:$0xff]  ;;  %v1699_v55 = vld [vmem:[%s2578_s9 + $0x20] sm:$0xff] }
 0x40f   : > { %1054 = vst [vmem:[#allocation2] sm:$0xff] %v1052_v43  ;;  %v1698_v56 = vld [vmem:[%s2578_s9 + $0x18] sm:$0xff]  ;;  %v1697_v57 = vld [vmem:[%s2578_s9 + $0x10] sm:$0xff]  ;;  %v1696_v61 = vld [vmem:[%s2578_s9 + $0x8] sm:$0xff] }
 0x410   : > { %1055 = vst [vmem:[#allocation2 + $0x8] sm:$0xff] %v1053_v44  ;;  %1148 = vmatpush.bf16.msra.mxu1 %v1693_v45  ;;  %v1695_v62 = vld [vmem:[%s2578_s9] sm:$0xff] }
 0x411   : > { %v1855_v63 = vld [vmem:[%s2580_s3 + $0x2] ss:$0 sm:$0xff]  ;;  %v1856_v5 = vld [vmem:[%s2580_s3 + $0x3] ss:$0 sm:$0xff] }
 0x412   : > { %1228 = vmatpush.bf16.msra.mxu2 %v1701_v53 }
 0x414   : > { %1149 = vmatpush.bf16.msra.mxu1 %v1692_v46 }
 0x416   : > { %1229 = vmatpush.bf16.msra.mxu2 %v1700_v54 }
 0x418   : > { %1150 = vmatpush.bf16.msra.mxu1 %v1691_v47 }
 0x41a   : > { %1230 = vmatpush.bf16.msra.mxu2 %v1699_v55 }
 0x41c   : > { %1151 = vmatpush.bf16.msra.mxu1 %v1690_v48 }
 0x41e   : > { %1231 = vmatpush.bf16.msra.mxu2 %v1698_v56 }
 0x420   : > { %1152 = vmatpush.bf16.msra.mxu1 %v1689_v49 }
 0x422   : > { %1232 = vmatpush.bf16.msra.mxu2 %v1697_v57 }
 0x424   : > { %1153 = vmatpush.bf16.msra.mxu1 %v1688_v50 }
 0x426   : > { %1233 = vmatpush.bf16.msra.mxu2 %v1696_v61 }
 0x428   : > { %1154 = vmatpush.bf16.msra.mxu1 %v1687_v51 }
 0x42a   : > { %1234 = vmatpush.bf16.msra.mxu2 %v1695_v62 }
 0x48b   : > { %v1078_v58 = vpop.f32.mrf.mxu0 }
 0x48c   : > { %v1079_v59 = vadd.f32 %v1078_v58, %v2601_v6 }
 0x48e   : > { %v1081_v60 = vpack.c.bf16 %v1079_v59, %v1079_v59 }
 0x490   : > { %1155 = vmatmul.bf16.vlgmr.msra.gmra.mxu1 %v1081_v60 }
 0x50d   : > { %v1156_v0 = vpop.f32.mrf.mxu1 }
 0x50e   : > { %v1157_v1 = vadd.f32 %v1855_v63, %v1156_v0 }
 0x510   : > { %v1160_v2 = vmax.f32 %v1157_v1, 0.0 }
 0x512   : > { %v1161_v3 = vpack.c.bf16 %v1160_v2, %v1160_v2 }
 0x514   : > { %1235 = vmatmul.bf16.vlgmr.msra.gmra.mxu2 %v1161_v3 }
 0x515   : > { %v1158_v4 = vpop.f32.mrf.mxu1 }
 0x597   : > { %v1236_v7 = vpop.f32.mrf.mxu2 }
 0x598   : > { %v1237_v8 = vadd.f32 %v1856_v5, %v1236_v7 }
 0x59a   : > { %v1240_v9 = vmax.f32 %v1237_v8, 0.0 }
 0x59c   : > { %1241 = vst [vmem:[#allocation3] sm:$0xff] %v1240_v9 }
 0x59f   : > { %v1238_v10 = vpop.f32.mrf.mxu2 }
 0x5a0 PF: > { %p1658_p13 = scmp.ne.s32.totalorder %s2346_s20, 2 }
 0x5a2   : > { %1245 = sbr.rel (%p1658_p13) target bundleno = 1579 (0x62b), region = 116 }
 0x5a7   : > { %v1247_v6 = vadd.f32 %v2666_v38, %v2620_v25  ;;  %v1246_v11 = vadd.f32 %v2664_v36, %v2618_v24 }
 0x5a9   : > { %1249 = vst [vmem:[#allocation16 + $0x8] sm:$0xff] %v1247_v6  ;;  %1267 = vmatpush.msra.mxu0 %v1247_v6 }
 0x5aa   : > { %1248 = vst [vmem:[#allocation16] sm:$0xff] %v1246_v11 }
 0x5ab   : > { %1268 = vmatpush.msra.mxu0 %v1246_v11 }
 0x5ac   : > { %1659 = vmatmul.msk.f32.vlgmr.msra.gmra.mxu0 %vm808_vm5, %v2636_v41 }
 0x629   : > { %v1270_v12 = vpop.f32.mrf.mxu0 }
 0x62a   : > { %1273 = vst [vmem:[#allocation17] sm:$0xff] %v1270_v12 }
 0x62b PF: > { %p1775_p10 = scmp.eq.s32.totalorder %s2346_s20, 2  ;;  %s2235_s21 = smov [#allocation16]  }
 0x62c   : > { %s1279_s4 = sshll.u32 %s2235_s21, 4  ;;  %s2821_s3 = sld [smem:[#allocation40_spill]]  ;;  %s1280_s4 = int_to_ptr.vmem [resolvable:$true] %s1279_s4 }
 0x62d   : > { %s2236_s8 = smov 128   ;;  %s2237_s25 = smov 8  }
 0x62e   : > { %s2822_s16 = sld [smem:[#allocation41_spill]]  ;;  %s2238_s5 = smov [#allocation17]  }
 0x62f   : > { %s1294_s23 = sshll.u32 %s2238_s5, 4  ;;  %s1295_s23 = int_to_ptr.vmem [resolvable:$true] %s1294_s23 }
 0x632   : > { %s1281_s6 = sshll.u32 %s2821_s3, 4  ;;  %s1282_s6 = int_to_ptr.hbm [resolvable:$true] %s1281_s6 }
 0x633   : > { %1735 = dma.vmem_to_hbm [thread:$0]  (%p1775_p10), %s1280_s4, 256, %s1282_s6, [#allocation6], %s2236_s8, %s2236_s8, %s2237_s25  }
 0x634   : > { %s1296_s19 = sshll.u32 %s2822_s16, 4  ;;  %s1297_s19 = int_to_ptr.hbm [resolvable:$true] %s1296_s19 }
 0x635   : > { %1737 = dma.vmem_to_hbm [thread:$0]  (%p1775_p10), %s1295_s23, 128, %s1297_s19, [#allocation18]  }
 0x636   : > { %2191 = dma.done.wait (%p1775_p10), [#allocation6], 256  }
 0x637   : > { %2193 = vsyncadd (%p1775_p10), [#allocation6], 4294967040 }
 0x638   : > { %2195 = dma.done.wait (%p1775_p10), [#allocation18], 128  }
 0x639   : > { %2197 = vsyncadd (%p1775_p10), [#allocation18], 4294967168 }
 0x63a PF: > { %s2823_s19 = sld [smem:[#allocation29_spill]]  ;;  %s2826_s29 = smov %s2204_s30 }
 0x63b   : > { %s2824_s24 = sld [smem:[#allocation31_spill]]  ;;  %s2827_s30 = smov %s2208_s15 }
 0x63c   : > { %s2825_s14 = sld [smem:[#allocation30_spill]]  ;;  %s2829_s16 = smov %s2216_s17 }
 0x63d   : > { %s2830_s17 = smov %s2220_s18 }
 0x640   : > { %p27_p3 = scmp.ge.s32.totalorder %s2823_s19, 5  }
 0x641   : > { %s2828_s15 = smov %s2824_s24 }
 0x642   : > { %s2831_s18 = smov %s2825_s14  ;;  %29 = sbr.rel (!%p27_p3) target bundleno = 19 (0x13), region = 188 }
 0x647   :  { %1315 = vsyncpa [#allocation5], 1 }
 0x648   :  { %1317 = vsyncpa [#allocation5 + $0x1], 1 }
 0x649   :  { %1318 = vsyncpa [#allocation10], 1 }
 0x64a   :  { %1319 = vsyncpa [#allocation6], 1 }
 0x64b   :  { %1321 = vsyncpa [#allocation6 + $0x1], 1 }
 0x64c   :  { %1322 = vsyncpa [#allocation18], 1 }
 0x64d   :  { %1323 = vsyncpa [#allocation7], 1 }
 0x64e   :  { %1325 = vsyncpa [#allocation7 + $0x1], 1 }

</bundles_post_ra>
